<compile_context>
chip_gen: v7x
topology: tpu7x:2x2x1
jax: 0.10.0
libtpu: 0.0.40
codegen_flags: <defaults>
</compile_context>

<pallas_src>
import functools
import math

import jax
import jax.numpy as jnp
from jax.experimental import pallas as pl
from jax.experimental.pallas import tpu as pltpu


# ---------------------------------------------------------------------------
# Pallas kernel: full SelfAttention forward for one batch block.
# ---------------------------------------------------------------------------
def _self_attention_kernel(
    q_ref,     # (BN, L, E)   f32, E minor
    k_ref,     # (BN, L, E)   f32
    v_ref,     # (BN, L, E)   f32
    wq_ref,    # (E, E)       bf16 block-diag per-head proj, 1/sqrt(E) folded in
    wk_ref,    # (E, E)       bf16 block-diag
    wv_ref,    # (E, E)       bf16 block-diag
    wo_ref,    # (E, E)       bf16 fc_out weight, transposed (y = x @ woT)
    bo_ref,    # (1, E)       f32  fc_out bias
    out_ref,   # (1, BN, L*E) if flat_out else (BN, L, E)
    *,
    heads: int,
    flat_out: bool,
):
    BN, L, E = q_ref.shape
    hd = E // heads
    f32 = jnp.float32
    bf16 = jnp.bfloat16

    def project(x_ref, w_ref):
        # Shared per-head projection as one (BN*L, E) @ (E, E) block-diag matmul
        # (keeps E minor; bf16 operands, f32 accumulation).
        x2 = x_ref[...].reshape(BN * L, E).astype(bf16)
        y2 = jnp.dot(x2, w_ref[...], preferred_element_type=f32)
        return y2.reshape(BN, L, E)

    q = project(q_ref, wq_ref)          # scale already folded into wq
    k = project(k_ref, wk_ref)
    v = project(v_ref, wv_ref)

    qb = q.astype(bf16)
    kb = k.astype(bf16)
    vb = v.astype(bf16)
    wo = wo_ref[...]                    # (E, E) bf16

    acc = jnp.zeros((BN * L, E), f32)
    for h in range(heads):              # static loop; heads is small
        sl = slice(h * hd, (h + 1) * hd)
        qh = qb[:, :, sl]               # (BN, L, hd) static lane slice
        kh = kb[:, :, sl]
        vh = vb[:, :, sl]

        # Energy: batched over the batch block, contracting hd (no k.T).
        energy = jax.lax.dot_general(
            qh, kh, dimension_numbers=(((2,), (2,)), ((0,), (0,))),
            preferred_element_type=f32)                   # (BN, L, L) f32

        # TODO(synk): mask=None path only; masked_fill branch not implemented.
        energy = energy - jnp.max(energy, axis=-1, keepdims=True)
        p = jnp.exp(energy)             # f32 softmax (v5e has no bf16 EUP/VPU)
        attn = p * pl.reciprocal(jnp.sum(p, axis=-1, keepdims=True), approx=True)

        ctx = jax.lax.dot_general(
            attn.astype(bf16), vh, dimension_numbers=(((2,), (1,)), ((0,), (0,))),
            preferred_element_type=f32)                   # (BN, L, hd) f32

        # fc_out with the head-concat folded in: sum_h ctx_h @ woT[h*hd:(h+1)*hd].
        acc = acc + jnp.dot(ctx.reshape(BN * L, hd).astype(bf16), wo[sl, :],
                            preferred_element_type=f32)

    out = acc + bo_ref[...]             # single hoisted bias broadcast, f32

    if flat_out:
        # Lane-dense store: minor dim L*E (>=128) -> unmasked vst.
        out_ref[...] = out.reshape(1, BN, L * E)
    else:
        out_ref[...] = out.reshape(BN, L, E)


# ---------------------------------------------------------------------------
# Wrapper: weight prep + pallas_call.
# ---------------------------------------------------------------------------
def self_attention(values, keys, query, params, *, heads, block_n=None, mask=None):
    """Pallas TPU SelfAttention.forward. values/keys/query: (N, L, E) f32."""
    if mask is not None:
        raise NotImplementedError("TODO(synk): mask path not implemented")
    N, L, E = query.shape
    assert E % heads == 0, "embed_size must be divisible by heads"
    f32, bf16 = jnp.float32, jnp.bfloat16

    if block_n is None:
        # >= 2 grid steps (v7x megacore sharding + pipeline overlap), not N.
        block_n = max(1, N // 2)
        while N % block_n:
            block_n -= 1
    assert N % block_n == 0
    G = N // block_n

    # Module scales energy by 1/sqrt(embed_size) (NOT 1/sqrt(head_dim)) -- keep it.
    scale = 1.0 / math.sqrt(float(E))
    eye = jnp.eye(heads, dtype=f32)
    # Block-diagonal per-head projections in "x @ W" form (keeps E minor in-kernel).
    wq_bd = (jnp.kron(eye, params["wq"].T.astype(f32)) * scale).astype(bf16)
    wk_bd = jnp.kron(eye, params["wk"].T.astype(f32)).astype(bf16)
    wv_bd = jnp.kron(eye, params["wv"].T.astype(f32)).astype(bf16)
    wo_t = params["wo"].T.astype(bf16)                    # (E, E)
    bo = params["bo"].reshape(1, E).astype(f32)           # (1, E)

    qf = query.astype(f32)
    kf = keys.astype(f32)
    vf = values.astype(f32)

    def full_spec(a):
        return pl.BlockSpec(a.shape, lambda i: (0,) * a.ndim)

    xspec = pl.BlockSpec((block_n, L, E), lambda i: (i, 0, 0))
    in_specs = [
        xspec, xspec, xspec,                               # q, k, v (E-minor blocks)
        full_spec(wq_bd), full_spec(wk_bd), full_spec(wv_bd),
        full_spec(wo_t), full_spec(bo),
    ]
    cparams = pltpu.CompilerParams(
        dimension_semantics=("parallel",),                 # batch-block axis
        vmem_limit_bytes=32 * 1024 * 1024,                 # headroom on v7x's 64 MiB
    )
    args = (qf, kf, vf, wq_bd, wk_bd, wv_bd, wo_t, bo)

    def run(flat_out):
        if flat_out:
            out_shape = jax.ShapeDtypeStruct((G, block_n, L * E), f32)
            out_spec = pl.BlockSpec((1, block_n, L * E), lambda i: (i, 0, 0))
        else:
            out_shape = jax.ShapeDtypeStruct((N, L, E), f32)
            out_spec = pl.BlockSpec((block_n, L, E), lambda i: (i, 0, 0))
        kern = functools.partial(_self_attention_kernel, heads=heads,
                                 flat_out=flat_out)
        out = pl.pallas_call(
            kern,
            out_shape=out_shape,
            grid_spec=pltpu.PrefetchScalarGridSpec(
                num_scalar_prefetch=0,
                grid=(G,),
                in_specs=in_specs,
                out_specs=out_spec,
            ),
            compiler_params=cparams,
        )(*args)
        return out.reshape(N, L, E)

    # Prefer the lane-dense flattened store; fall back to the 3-D store if Mosaic
    # cannot lower the (L, E) -> (L*E) value collapse at this (tiny) shape.
    try:
        return jax.block_until_ready(run(flat_out=True))
    except Exception:
        return run(flat_out=False)


# ---------------------------------------------------------------------------
# Parameters (torch nn.Linear convention) and a plain-JAX reference.
# ---------------------------------------------------------------------------
def init_self_attention_params(key, *, embed_size, heads):
    hd = embed_size // heads
    ks = jax.random.split(key, 5)

    def nrm(k, shape, s=0.1):
        return (s * jax.random.normal(k, shape)).astype(jnp.float32)

    return {
        # nn.Linear weight is (out_features, in_features); y = x @ W.T (+ b).
        "wv": nrm(ks[0], (hd, hd)),
        "wk": nrm(ks[1], (hd, hd)),
        "wq": nrm(ks[2], (hd, hd)),
        "wo": nrm(ks[3], (embed_size, embed_size)),
        "bo": nrm(ks[4], (embed_size,)),
    }


def self_attention_reference(values, keys, query, params, *, heads):
    """Direct transcription of the PyTorch forward (mask=None)."""
    N, L, E = query.shape
    hd = E // heads
    v = values.reshape(N, L, heads, hd) @ params["wv"].T
    k = keys.reshape(N, L, heads, hd) @ params["wk"].T
    q = query.reshape(N, L, heads, hd) @ params["wq"].T
    energy = jnp.einsum("nqhd,nkhd->nhqk", q, k)
    attn = jax.nn.softmax(energy / math.sqrt(float(E)), axis=3)
    out = jnp.einsum("nhql,nlhd->nqhd", attn, v).reshape(N, L, E)
    return out @ params["wo"].T + params["bo"]


if __name__ == "__main__":
    N, L, E, HEADS = 2, 8, 32, 4   # batch, seq_len, embed_size, heads (head_dim = 8)

    key = jax.random.PRNGKey(0)
    pkey, vkey, kkey, qkey = jax.random.split(key, 4)
    params = init_self_attention_params(pkey, embed_size=E, heads=HEADS)

    values = jax.random.normal(vkey, (N, L, E), dtype=jnp.float32)
    keys_in = jax.random.normal(kkey, (N, L, E), dtype=jnp.float32)
    query = jax.random.normal(qkey, (N, L, E), dtype=jnp.float32)

    out = self_attention(values, keys_in, query, params, heads=HEADS)
    out = jax.block_until_ready(out)

    assert out.shape == (N, L, E), out.shape
    assert bool(jnp.all(jnp.isfinite(out)))

    ref = self_attention_reference(values, keys_in, query, params, heads=HEADS)
    max_err = float(jnp.max(jnp.abs(out - ref)))
    assert max_err < 5e-2, f"max abs err {max_err}"

    print("KERNEL_OK")
</pallas_src>

<mosaic_0001>
module attributes {stable_mosaic.version = 11 : i64} {
  func.func @_self_attention_kernel(%arg0: i32, %arg1: memref<1x8x32xf32, #tpu.memory_space<vmem>>, %arg2: memref<1x8x32xf32, #tpu.memory_space<vmem>>, %arg3: memref<1x8x32xf32, #tpu.memory_space<vmem>>, %arg4: memref<32x32xbf16, #tpu.memory_space<vmem>>, %arg5: memref<32x32xbf16, #tpu.memory_space<vmem>>, %arg6: memref<32x32xbf16, #tpu.memory_space<vmem>>, %arg7: memref<32x32xbf16, #tpu.memory_space<vmem>>, %arg8: memref<1x32xf32, #tpu.memory_space<vmem>>, %arg9: memref<1x1x256xf32, #tpu.memory_space<vmem>>) attributes {dimension_semantics = [#tpu.dimension_semantics<parallel>], iteration_bounds = array<i64: 2>, scalar_prefetch = 0 : i64, scratch_operands = 0 : i64, tpu.core_type = #tpu.core_type<tc>, window_params = [{transform_indices = @transform_0, window_bounds = array<i64: 1, 8, 32>}, {transform_indices = @transform_1, window_bounds = array<i64: 1, 8, 32>}, {transform_indices = @transform_2, window_bounds = array<i64: 1, 8, 32>}, {pipeline_mode = #tpu.pipeline_mode<synchronous>, transform_indices = @transform_3, window_bounds = array<i64: 32, 32>}, {pipeline_mode = #tpu.pipeline_mode<synchronous>, transform_indices = @transform_4, window_bounds = array<i64: 32, 32>}, {pipeline_mode = #tpu.pipeline_mode<synchronous>, transform_indices = @transform_5, window_bounds = array<i64: 32, 32>}, {pipeline_mode = #tpu.pipeline_mode<synchronous>, transform_indices = @transform_6, window_bounds = array<i64: 32, 32>}, {pipeline_mode = #tpu.pipeline_mode<synchronous>, transform_indices = @transform_7, window_bounds = array<i64: 1, 32>}, {transform_indices = @transform_8, window_bounds = array<i64: 1, 1, 256>}]} {
    %c0 = arith.constant 0 : index
    %c0_0 = arith.constant 0 : index
    %c0_1 = arith.constant 0 : index
    %0 = vector.load %arg1[%c0, %c0_0, %c0_1] : memref<1x8x32xf32, #tpu.memory_space<vmem>>, vector<1x8x32xf32>
    %1 = vector.shape_cast %0 : vector<1x8x32xf32> to vector<8x32xf32>
    %2 = arith.truncf %1 : vector<8x32xf32> to vector<8x32xbf16>
    %c0_2 = arith.constant 0 : index
    %c0_3 = arith.constant 0 : index
    %3 = vector.load %arg4[%c0_2, %c0_3] : memref<32x32xbf16, #tpu.memory_space<vmem>>, vector<32x32xbf16>
    %cst = arith.constant dense<0.000000e+00> : vector<8x32xf32>
    %4 = tpu.matmul %2, %3, %cst {dimension_numbers = #tpu.dot_dimension_numbers<[1], [0], [0], [1], [0, 0, 1, 1], [], []>} : vector<8x32xbf16>, vector<32x32xbf16>, vector<8x32xf32> -> vector<8x32xf32>
    %5 = vector.shape_cast %4 : vector<8x32xf32> to vector<1x8x32xf32>
    %c0_4 = arith.constant 0 : index
    %c0_5 = arith.constant 0 : index
    %c0_6 = arith.constant 0 : index
    %6 = vector.load %arg2[%c0_4, %c0_5, %c0_6] : memref<1x8x32xf32, #tpu.memory_space<vmem>>, vector<1x8x32xf32>
    %7 = vector.shape_cast %6 : vector<1x8x32xf32> to vector<8x32xf32>
    %8 = arith.truncf %7 : vector<8x32xf32> to vector<8x32xbf16>
    %c0_7 = arith.constant 0 : index
    %c0_8 = arith.constant 0 : index
    %9 = vector.load %arg5[%c0_7, %c0_8] : memref<32x32xbf16, #tpu.memory_space<vmem>>, vector<32x32xbf16>
    %cst_9 = arith.constant dense<0.000000e+00> : vector<8x32xf32>
    %10 = tpu.matmul %8, %9, %cst_9 {dimension_numbers = #tpu.dot_dimension_numbers<[1], [0], [0], [1], [0, 0, 1, 1], [], []>} : vector<8x32xbf16>, vector<32x32xbf16>, vector<8x32xf32> -> vector<8x32xf32>
    %11 = vector.shape_cast %10 : vector<8x32xf32> to vector<1x8x32xf32>
    %c0_10 = arith.constant 0 : index
    %c0_11 = arith.constant 0 : index
    %c0_12 = arith.constant 0 : index
    %12 = vector.load %arg3[%c0_10, %c0_11, %c0_12] : memref<1x8x32xf32, #tpu.memory_space<vmem>>, vector<1x8x32xf32>
    %13 = vector.shape_cast %12 : vector<1x8x32xf32> to vector<8x32xf32>
    %14 = arith.truncf %13 : vector<8x32xf32> to vector<8x32xbf16>
    %c0_13 = arith.constant 0 : index
    %c0_14 = arith.constant 0 : index
    %15 = vector.load %arg6[%c0_13, %c0_14] : memref<32x32xbf16, #tpu.memory_space<vmem>>, vector<32x32xbf16>
    %cst_15 = arith.constant dense<0.000000e+00> : vector<8x32xf32>
    %16 = tpu.matmul %14, %15, %cst_15 {dimension_numbers = #tpu.dot_dimension_numbers<[1], [0], [0], [1], [0, 0, 1, 1], [], []>} : vector<8x32xbf16>, vector<32x32xbf16>, vector<8x32xf32> -> vector<8x32xf32>
    %17 = vector.shape_cast %16 : vector<8x32xf32> to vector<1x8x32xf32>
    %18 = arith.truncf %5 : vector<1x8x32xf32> to vector<1x8x32xbf16>
    %19 = arith.truncf %11 : vector<1x8x32xf32> to vector<1x8x32xbf16>
    %20 = arith.truncf %17 : vector<1x8x32xf32> to vector<1x8x32xbf16>
    %c0_16 = arith.constant 0 : index
    %c0_17 = arith.constant 0 : index
    %21 = vector.load %arg7[%c0_16, %c0_17] : memref<32x32xbf16, #tpu.memory_space<vmem>>, vector<32x32xbf16>
    %cst_18 = arith.constant 0.000000e+00 : f32
    %22 = vector.broadcast %cst_18 : f32 to vector<8x32xf32>
    %23 = vector.extract_strided_slice %18 {offsets = [0, 0, 0], sizes = [1, 8, 8], strides = [1, 1, 1]} : vector<1x8x32xbf16> to vector<1x8x8xbf16>
    %24 = vector.extract_strided_slice %19 {offsets = [0, 0, 0], sizes = [1, 8, 8], strides = [1, 1, 1]} : vector<1x8x32xbf16> to vector<1x8x8xbf16>
    %25 = vector.extract_strided_slice %20 {offsets = [0, 0, 0], sizes = [1, 8, 8], strides = [1, 1, 1]} : vector<1x8x32xbf16> to vector<1x8x8xbf16>
    %cst_19 = arith.constant dense<0.000000e+00> : vector<1x8x8xf32>
    %26 = tpu.matmul %23, %24, %cst_19 {dimension_numbers = #tpu.dot_dimension_numbers<[2], [2], [1], [1], [0, 0, 0, 1, 1, 1], [0], [0]>} : vector<1x8x8xbf16>, vector<1x8x8xbf16>, vector<1x8x8xf32> -> vector<1x8x8xf32>
    %cst_20 = arith.constant dense<0xFF800000> : vector<1x8xf32>
    %27 = vector.multi_reduction <maximumf>, %26, %cst_20 [2] : vector<1x8x8xf32> to vector<1x8xf32>
    %28 = vector.shape_cast %27 : vector<1x8xf32> to vector<1x8x1xf32>
    %29 = vector.broadcast %28 : vector<1x8x1xf32> to vector<1x8x8xf32>
    %30 = arith.subf %26, %29 : vector<1x8x8xf32>
    %31 = math.exp %30 : vector<1x8x8xf32>
    %cst_21 = arith.constant dense<0.000000e+00> : vector<1x8xf32>
    %32 = vector.multi_reduction <add>, %31, %cst_21 [2] : vector<1x8x8xf32> to vector<1x8xf32>
    %33 = vector.shape_cast %32 : vector<1x8xf32> to vector<1x8x1xf32>
    %34 = tpu.reciprocal %33 {approx = true} : vector<1x8x1xf32> -> vector<1x8x1xf32>
    %35 = vector.broadcast %34 : vector<1x8x1xf32> to vector<1x8x8xf32>
    %36 = arith.mulf %31, %35 : vector<1x8x8xf32>
    %37 = arith.truncf %36 : vector<1x8x8xf32> to vector<1x8x8xbf16>
    %cst_22 = arith.constant dense<0.000000e+00> : vector<1x8x8xf32>
    %38 = tpu.matmul %37, %25, %cst_22 {dimension_numbers = #tpu.dot_dimension_numbers<[2], [1], [1], [2], [0, 0, 0, 1, 1, 2], [0], [0]>} : vector<1x8x8xbf16>, vector<1x8x8xbf16>, vector<1x8x8xf32> -> vector<1x8x8xf32>
    %39 = vector.shape_cast %38 : vector<1x8x8xf32> to vector<8x8xf32>
    %40 = arith.truncf %39 : vector<8x8xf32> to vector<8x8xbf16>
    %41 = vector.extract_strided_slice %21 {offsets = [0, 0], sizes = [8, 32], strides = [1, 1]} : vector<32x32xbf16> to vector<8x32xbf16>
    %cst_23 = arith.constant dense<0.000000e+00> : vector<8x32xf32>
    %42 = tpu.matmul %40, %41, %cst_23 {dimension_numbers = #tpu.dot_dimension_numbers<[1], [0], [0], [1], [0, 0, 1, 1], [], []>} : vector<8x8xbf16>, vector<8x32xbf16>, vector<8x32xf32> -> vector<8x32xf32>
    %43 = arith.addf %22, %42 : vector<8x32xf32>
    %44 = vector.extract_strided_slice %18 {offsets = [0, 0, 8], sizes = [1, 8, 8], strides = [1, 1, 1]} : vector<1x8x32xbf16> to vector<1x8x8xbf16>
    %45 = vector.extract_strided_slice %19 {offsets = [0, 0, 8], sizes = [1, 8, 8], strides = [1, 1, 1]} : vector<1x8x32xbf16> to vector<1x8x8xbf16>
    %46 = vector.extract_strided_slice %20 {offsets = [0, 0, 8], sizes = [1, 8, 8], strides = [1, 1, 1]} : vector<1x8x32xbf16> to vector<1x8x8xbf16>
    %cst_24 = arith.constant dense<0.000000e+00> : vector<1x8x8xf32>
    %47 = tpu.matmul %44, %45, %cst_24 {dimension_numbers = #tpu.dot_dimension_numbers<[2], [2], [1], [1], [0, 0, 0, 1, 1, 1], [0], [0]>} : vector<1x8x8xbf16>, vector<1x8x8xbf16>, vector<1x8x8xf32> -> vector<1x8x8xf32>
    %cst_25 = arith.constant dense<0xFF800000> : vector<1x8xf32>
    %48 = vector.multi_reduction <maximumf>, %47, %cst_25 [2] : vector<1x8x8xf32> to vector<1x8xf32>
    %49 = vector.shape_cast %48 : vector<1x8xf32> to vector<1x8x1xf32>
    %50 = vector.broadcast %49 : vector<1x8x1xf32> to vector<1x8x8xf32>
    %51 = arith.subf %47, %50 : vector<1x8x8xf32>
    %52 = math.exp %51 : vector<1x8x8xf32>
    %cst_26 = arith.constant dense<0.000000e+00> : vector<1x8xf32>
    %53 = vector.multi_reduction <add>, %52, %cst_26 [2] : vector<1x8x8xf32> to vector<1x8xf32>
    %54 = vector.shape_cast %53 : vector<1x8xf32> to vector<1x8x1xf32>
    %55 = tpu.reciprocal %54 {approx = true} : vector<1x8x1xf32> -> vector<1x8x1xf32>
    %56 = vector.broadcast %55 : vector<1x8x1xf32> to vector<1x8x8xf32>
    %57 = arith.mulf %52, %56 : vector<1x8x8xf32>
    %58 = arith.truncf %57 : vector<1x8x8xf32> to vector<1x8x8xbf16>
    %cst_27 = arith.constant dense<0.000000e+00> : vector<1x8x8xf32>
    %59 = tpu.matmul %58, %46, %cst_27 {dimension_numbers = #tpu.dot_dimension_numbers<[2], [1], [1], [2], [0, 0, 0, 1, 1, 2], [0], [0]>} : vector<1x8x8xbf16>, vector<1x8x8xbf16>, vector<1x8x8xf32> -> vector<1x8x8xf32>
    %60 = vector.shape_cast %59 : vector<1x8x8xf32> to vector<8x8xf32>
    %61 = arith.truncf %60 : vector<8x8xf32> to vector<8x8xbf16>
    %62 = vector.extract_strided_slice %21 {offsets = [8, 0], sizes = [8, 32], strides = [1, 1]} : vector<32x32xbf16> to vector<8x32xbf16>
    %cst_28 = arith.constant dense<0.000000e+00> : vector<8x32xf32>
    %63 = tpu.matmul %61, %62, %cst_28 {dimension_numbers = #tpu.dot_dimension_numbers<[1], [0], [0], [1], [0, 0, 1, 1], [], []>} : vector<8x8xbf16>, vector<8x32xbf16>, vector<8x32xf32> -> vector<8x32xf32>
    %64 = arith.addf %43, %63 : vector<8x32xf32>
    %65 = vector.extract_strided_slice %18 {offsets = [0, 0, 16], sizes = [1, 8, 8], strides = [1, 1, 1]} : vector<1x8x32xbf16> to vector<1x8x8xbf16>
    %66 = vector.extract_strided_slice %19 {offsets = [0, 0, 16], sizes = [1, 8, 8], strides = [1, 1, 1]} : vector<1x8x32xbf16> to vector<1x8x8xbf16>
    %67 = vector.extract_strided_slice %20 {offsets = [0, 0, 16], sizes = [1, 8, 8], strides = [1, 1, 1]} : vector<1x8x32xbf16> to vector<1x8x8xbf16>
    %cst_29 = arith.constant dense<0.000000e+00> : vector<1x8x8xf32>
    %68 = tpu.matmul %65, %66, %cst_29 {dimension_numbers = #tpu.dot_dimension_numbers<[2], [2], [1], [1], [0, 0, 0, 1, 1, 1], [0], [0]>} : vector<1x8x8xbf16>, vector<1x8x8xbf16>, vector<1x8x8xf32> -> vector<1x8x8xf32>
    %cst_30 = arith.constant dense<0xFF800000> : vector<1x8xf32>
    %69 = vector.multi_reduction <maximumf>, %68, %cst_30 [2] : vector<1x8x8xf32> to vector<1x8xf32>
    %70 = vector.shape_cast %69 : vector<1x8xf32> to vector<1x8x1xf32>
    %71 = vector.broadcast %70 : vector<1x8x1xf32> to vector<1x8x8xf32>
    %72 = arith.subf %68, %71 : vector<1x8x8xf32>
    %73 = math.exp %72 : vector<1x8x8xf32>
    %cst_31 = arith.constant dense<0.000000e+00> : vector<1x8xf32>
    %74 = vector.multi_reduction <add>, %73, %cst_31 [2] : vector<1x8x8xf32> to vector<1x8xf32>
    %75 = vector.shape_cast %74 : vector<1x8xf32> to vector<1x8x1xf32>
    %76 = tpu.reciprocal %75 {approx = true} : vector<1x8x1xf32> -> vector<1x8x1xf32>
    %77 = vector.broadcast %76 : vector<1x8x1xf32> to vector<1x8x8xf32>
    %78 = arith.mulf %73, %77 : vector<1x8x8xf32>
    %79 = arith.truncf %78 : vector<1x8x8xf32> to vector<1x8x8xbf16>
    %cst_32 = arith.constant dense<0.000000e+00> : vector<1x8x8xf32>
    %80 = tpu.matmul %79, %67, %cst_32 {dimension_numbers = #tpu.dot_dimension_numbers<[2], [1], [1], [2], [0, 0, 0, 1, 1, 2], [0], [0]>} : vector<1x8x8xbf16>, vector<1x8x8xbf16>, vector<1x8x8xf32> -> vector<1x8x8xf32>
    %81 = vector.shape_cast %80 : vector<1x8x8xf32> to vector<8x8xf32>
    %82 = arith.truncf %81 : vector<8x8xf32> to vector<8x8xbf16>
    %83 = vector.extract_strided_slice %21 {offsets = [16, 0], sizes = [8, 32], strides = [1, 1]} : vector<32x32xbf16> to vector<8x32xbf16>
    %cst_33 = arith.constant dense<0.000000e+00> : vector<8x32xf32>
    %84 = tpu.matmul %82, %83, %cst_33 {dimension_numbers = #tpu.dot_dimension_numbers<[1], [0], [0], [1], [0, 0, 1, 1], [], []>} : vector<8x8xbf16>, vector<8x32xbf16>, vector<8x32xf32> -> vector<8x32xf32>
    %85 = arith.addf %64, %84 : vector<8x32xf32>
    %86 = vector.extract_strided_slice %18 {offsets = [0, 0, 24], sizes = [1, 8, 8], strides = [1, 1, 1]} : vector<1x8x32xbf16> to vector<1x8x8xbf16>
    %87 = vector.extract_strided_slice %19 {offsets = [0, 0, 24], sizes = [1, 8, 8], strides = [1, 1, 1]} : vector<1x8x32xbf16> to vector<1x8x8xbf16>
    %88 = vector.extract_strided_slice %20 {offsets = [0, 0, 24], sizes = [1, 8, 8], strides = [1, 1, 1]} : vector<1x8x32xbf16> to vector<1x8x8xbf16>
    %cst_34 = arith.constant dense<0.000000e+00> : vector<1x8x8xf32>
    %89 = tpu.matmul %86, %87, %cst_34 {dimension_numbers = #tpu.dot_dimension_numbers<[2], [2], [1], [1], [0, 0, 0, 1, 1, 1], [0], [0]>} : vector<1x8x8xbf16>, vector<1x8x8xbf16>, vector<1x8x8xf32> -> vector<1x8x8xf32>
    %cst_35 = arith.constant dense<0xFF800000> : vector<1x8xf32>
    %90 = vector.multi_reduction <maximumf>, %89, %cst_35 [2] : vector<1x8x8xf32> to vector<1x8xf32>
    %91 = vector.shape_cast %90 : vector<1x8xf32> to vector<1x8x1xf32>
    %92 = vector.broadcast %91 : vector<1x8x1xf32> to vector<1x8x8xf32>
    %93 = arith.subf %89, %92 : vector<1x8x8xf32>
    %94 = math.exp %93 : vector<1x8x8xf32>
    %cst_36 = arith.constant dense<0.000000e+00> : vector<1x8xf32>
    %95 = vector.multi_reduction <add>, %94, %cst_36 [2] : vector<1x8x8xf32> to vector<1x8xf32>
    %96 = vector.shape_cast %95 : vector<1x8xf32> to vector<1x8x1xf32>
    %97 = tpu.reciprocal %96 {approx = true} : vector<1x8x1xf32> -> vector<1x8x1xf32>
    %98 = vector.broadcast %97 : vector<1x8x1xf32> to vector<1x8x8xf32>
    %99 = arith.mulf %94, %98 : vector<1x8x8xf32>
    %100 = arith.truncf %99 : vector<1x8x8xf32> to vector<1x8x8xbf16>
    %cst_37 = arith.constant dense<0.000000e+00> : vector<1x8x8xf32>
    %101 = tpu.matmul %100, %88, %cst_37 {dimension_numbers = #tpu.dot_dimension_numbers<[2], [1], [1], [2], [0, 0, 0, 1, 1, 2], [0], [0]>} : vector<1x8x8xbf16>, vector<1x8x8xbf16>, vector<1x8x8xf32> -> vector<1x8x8xf32>
    %102 = vector.shape_cast %101 : vector<1x8x8xf32> to vector<8x8xf32>
    %103 = arith.truncf %102 : vector<8x8xf32> to vector<8x8xbf16>
    %104 = vector.extract_strided_slice %21 {offsets = [24, 0], sizes = [8, 32], strides = [1, 1]} : vector<32x32xbf16> to vector<8x32xbf16>
    %cst_38 = arith.constant dense<0.000000e+00> : vector<8x32xf32>
    %105 = tpu.matmul %103, %104, %cst_38 {dimension_numbers = #tpu.dot_dimension_numbers<[1], [0], [0], [1], [0, 0, 1, 1], [], []>} : vector<8x8xbf16>, vector<8x32xbf16>, vector<8x32xf32> -> vector<8x32xf32>
    %106 = arith.addf %85, %105 : vector<8x32xf32>
    %c0_39 = arith.constant 0 : index
    %c0_40 = arith.constant 0 : index
    %107 = vector.load %arg8[%c0_39, %c0_40] : memref<1x32xf32, #tpu.memory_space<vmem>>, vector<1x32xf32>
    %108 = vector.broadcast %107 : vector<1x32xf32> to vector<8x32xf32>
    %109 = arith.addf %106, %108 : vector<8x32xf32>
    %110 = vector.shape_cast %109 : vector<8x32xf32> to vector<1x1x256xf32>
    %c0_41 = arith.constant 0 : index
    %c0_42 = arith.constant 0 : index
    %c0_43 = arith.constant 0 : index
    %111 = vector.load %arg9[%c0_41, %c0_42, %c0_43] : memref<1x1x256xf32, #tpu.memory_space<vmem>>, vector<1x1x256xf32>
    tpu.vector_store %arg9[%c0_41, %c0_42, %c0_43], %110 {strides = array<i32>} : memref<1x1x256xf32, #tpu.memory_space<vmem>>, vector<1x1x256xf32>,
    return
  }
  func.func @transform_0(%arg0: i32) -> (i32, i32, i32) {
    %c0_i32 = arith.constant 0 : i32
    %c0_i32_0 = arith.constant 0 : i32
    %c0_i32_1 = arith.constant 0 : i32
    return %arg0, %c0_i32, %c0_i32_0 : i32, i32, i32
  }
  func.func @transform_1(%arg0: i32) -> (i32, i32, i32) {
    %c0_i32 = arith.constant 0 : i32
    %c0_i32_0 = arith.constant 0 : i32
    %c0_i32_1 = arith.constant 0 : i32
    return %arg0, %c0_i32, %c0_i32_0 : i32, i32, i32
  }
  func.func @transform_2(%arg0: i32) -> (i32, i32, i32) {
    %c0_i32 = arith.constant 0 : i32
    %c0_i32_0 = arith.constant 0 : i32
    %c0_i32_1 = arith.constant 0 : i32
    return %arg0, %c0_i32, %c0_i32_0 : i32, i32, i32
  }
  func.func @transform_3(%arg0: i32) -> (i32, i32) {
    %c0_i32 = arith.constant 0 : i32
    %c0_i32_0 = arith.constant 0 : i32
    %c0_i32_1 = arith.constant 0 : i32
    return %c0_i32, %c0_i32_0 : i32, i32
  }
  func.func @transform_4(%arg0: i32) -> (i32, i32) {
    %c0_i32 = arith.constant 0 : i32
    %c0_i32_0 = arith.constant 0 : i32
    %c0_i32_1 = arith.constant 0 : i32
    return %c0_i32, %c0_i32_0 : i32, i32
  }
  func.func @transform_5(%arg0: i32) -> (i32, i32) {
    %c0_i32 = arith.constant 0 : i32
    %c0_i32_0 = arith.constant 0 : i32
    %c0_i32_1 = arith.constant 0 : i32
    return %c0_i32, %c0_i32_0 : i32, i32
  }
  func.func @transform_6(%arg0: i32) -> (i32, i32) {
    %c0_i32 = arith.constant 0 : i32
    %c0_i32_0 = arith.constant 0 : i32
    %c0_i32_1 = arith.constant 0 : i32
    return %c0_i32, %c0_i32_0 : i32, i32
  }
  func.func @transform_7(%arg0: i32) -> (i32, i32) {
    %c0_i32 = arith.constant 0 : i32
    %c0_i32_0 = arith.constant 0 : i32
    %c0_i32_1 = arith.constant 0 : i32
    return %c0_i32, %c0_i32_0 : i32, i32
  }
  func.func @transform_8(%arg0: i32) -> (i32, i32, i32) {
    %c0_i32 = arith.constant 0 : i32
    %c0_i32_0 = arith.constant 0 : i32
    %c0_i32_1 = arith.constant 0 : i32
    return %arg0, %c0_i32, %c0_i32_0 : i32, i32, i32
  }
}

module attributes {stable_mosaic.version = 11 : i64} {
  func.func @_self_attention_kernel(%arg0: i32, %arg1: memref<1x8x32xf32, #tpu.memory_space<vmem>>, %arg2: memref<1x8x32xf32, #tpu.memory_space<vmem>>, %arg3: memref<1x8x32xf32, #tpu.memory_space<vmem>>, %arg4: memref<32x32xbf16, #tpu.memory_space<vmem>>, %arg5: memref<32x32xbf16, #tpu.memory_space<vmem>>, %arg6: memref<32x32xbf16, #tpu.memory_space<vmem>>, %arg7: memref<32x32xbf16, #tpu.memory_space<vmem>>, %arg8: memref<1x32xf32, #tpu.memory_space<vmem>>, %arg9: memref<1x8x32xf32, #tpu.memory_space<vmem>>) attributes {dimension_semantics = [#tpu.dimension_semantics<parallel>], iteration_bounds = array<i64: 2>, scalar_prefetch = 0 : i64, scratch_operands = 0 : i64, tpu.core_type = #tpu.core_type<tc>, window_params = [{transform_indices = @transform_0, window_bounds = array<i64: 1, 8, 32>}, {transform_indices = @transform_1, window_bounds = array<i64: 1, 8, 32>}, {transform_indices = @transform_2, window_bounds = array<i64: 1, 8, 32>}, {pipeline_mode = #tpu.pipeline_mode<synchronous>, transform_indices = @transform_3, window_bounds = array<i64: 32, 32>}, {pipeline_mode = #tpu.pipeline_mode<synchronous>, transform_indices = @transform_4, window_bounds = array<i64: 32, 32>}, {pipeline_mode = #tpu.pipeline_mode<synchronous>, transform_indices = @transform_5, window_bounds = array<i64: 32, 32>}, {pipeline_mode = #tpu.pipeline_mode<synchronous>, transform_indices = @transform_6, window_bounds = array<i64: 32, 32>}, {pipeline_mode = #tpu.pipeline_mode<synchronous>, transform_indices = @transform_7, window_bounds = array<i64: 1, 32>}, {transform_indices = @transform_8, window_bounds = array<i64: 1, 8, 32>}]} {
    %c0 = arith.constant 0 : index
    %c0_0 = arith.constant 0 : index
    %c0_1 = arith.constant 0 : index
    %0 = vector.load %arg1[%c0, %c0_0, %c0_1] : memref<1x8x32xf32, #tpu.memory_space<vmem>>, vector<1x8x32xf32>
    %1 = vector.shape_cast %0 : vector<1x8x32xf32> to vector<8x32xf32>
    %2 = arith.truncf %1 : vector<8x32xf32> to vector<8x32xbf16>
    %c0_2 = arith.constant 0 : index
    %c0_3 = arith.constant 0 : index
    %3 = vector.load %arg4[%c0_2, %c0_3] : memref<32x32xbf16, #tpu.memory_space<vmem>>, vector<32x32xbf16>
    %cst = arith.constant dense<0.000000e+00> : vector<8x32xf32>
    %4 = tpu.matmul %2, %3, %cst {dimension_numbers = #tpu.dot_dimension_numbers<[1], [0], [0], [1], [0, 0, 1, 1], [], []>} : vector<8x32xbf16>, vector<32x32xbf16>, vector<8x32xf32> -> vector<8x32xf32>
    %5 = vector.shape_cast %4 : vector<8x32xf32> to vector<1x8x32xf32>
    %c0_4 = arith.constant 0 : index
    %c0_5 = arith.constant 0 : index
    %c0_6 = arith.constant 0 : index
    %6 = vector.load %arg2[%c0_4, %c0_5, %c0_6] : memref<1x8x32xf32, #tpu.memory_space<vmem>>, vector<1x8x32xf32>
    %7 = vector.shape_cast %6 : vector<1x8x32xf32> to vector<8x32xf32>
    %8 = arith.truncf %7 : vector<8x32xf32> to vector<8x32xbf16>
    %c0_7 = arith.constant 0 : index
    %c0_8 = arith.constant 0 : index
    %9 = vector.load %arg5[%c0_7, %c0_8] : memref<32x32xbf16, #tpu.memory_space<vmem>>, vector<32x32xbf16>
    %cst_9 = arith.constant dense<0.000000e+00> : vector<8x32xf32>
    %10 = tpu.matmul %8, %9, %cst_9 {dimension_numbers = #tpu.dot_dimension_numbers<[1], [0], [0], [1], [0, 0, 1, 1], [], []>} : vector<8x32xbf16>, vector<32x32xbf16>, vector<8x32xf32> -> vector<8x32xf32>
    %11 = vector.shape_cast %10 : vector<8x32xf32> to vector<1x8x32xf32>
    %c0_10 = arith.constant 0 : index
    %c0_11 = arith.constant 0 : index
    %c0_12 = arith.constant 0 : index
    %12 = vector.load %arg3[%c0_10, %c0_11, %c0_12] : memref<1x8x32xf32, #tpu.memory_space<vmem>>, vector<1x8x32xf32>
    %13 = vector.shape_cast %12 : vector<1x8x32xf32> to vector<8x32xf32>
    %14 = arith.truncf %13 : vector<8x32xf32> to vector<8x32xbf16>
    %c0_13 = arith.constant 0 : index
    %c0_14 = arith.constant 0 : index
    %15 = vector.load %arg6[%c0_13, %c0_14] : memref<32x32xbf16, #tpu.memory_space<vmem>>, vector<32x32xbf16>
    %cst_15 = arith.constant dense<0.000000e+00> : vector<8x32xf32>
    %16 = tpu.matmul %14, %15, %cst_15 {dimension_numbers = #tpu.dot_dimension_numbers<[1], [0], [0], [1], [0, 0, 1, 1], [], []>} : vector<8x32xbf16>, vector<32x32xbf16>, vector<8x32xf32> -> vector<8x32xf32>
    %17 = vector.shape_cast %16 : vector<8x32xf32> to vector<1x8x32xf32>
    %18 = arith.truncf %5 : vector<1x8x32xf32> to vector<1x8x32xbf16>
    %19 = arith.truncf %11 : vector<1x8x32xf32> to vector<1x8x32xbf16>
    %20 = arith.truncf %17 : vector<1x8x32xf32> to vector<1x8x32xbf16>
    %c0_16 = arith.constant 0 : index
    %c0_17 = arith.constant 0 : index
    %21 = vector.load %arg7[%c0_16, %c0_17] : memref<32x32xbf16, #tpu.memory_space<vmem>>, vector<32x32xbf16>
    %cst_18 = arith.constant 0.000000e+00 : f32
    %22 = vector.broadcast %cst_18 : f32 to vector<8x32xf32>
    %23 = vector.extract_strided_slice %18 {offsets = [0, 0, 0], sizes = [1, 8, 8], strides = [1, 1, 1]} : vector<1x8x32xbf16> to vector<1x8x8xbf16>
    %24 = vector.extract_strided_slice %19 {offsets = [0, 0, 0], sizes = [1, 8, 8], strides = [1, 1, 1]} : vector<1x8x32xbf16> to vector<1x8x8xbf16>
    %25 = vector.extract_strided_slice %20 {offsets = [0, 0, 0], sizes = [1, 8, 8], strides = [1, 1, 1]} : vector<1x8x32xbf16> to vector<1x8x8xbf16>
    %cst_19 = arith.constant dense<0.000000e+00> : vector<1x8x8xf32>
    %26 = tpu.matmul %23, %24, %cst_19 {dimension_numbers = #tpu.dot_dimension_numbers<[2], [2], [1], [1], [0, 0, 0, 1, 1, 1], [0], [0]>} : vector<1x8x8xbf16>, vector<1x8x8xbf16>, vector<1x8x8xf32> -> vector<1x8x8xf32>
    %cst_20 = arith.constant dense<0xFF800000> : vector<1x8xf32>
    %27 = vector.multi_reduction <maximumf>, %26, %cst_20 [2] : vector<1x8x8xf32> to vector<1x8xf32>
    %28 = vector.shape_cast %27 : vector<1x8xf32> to vector<1x8x1xf32>
    %29 = vector.broadcast %28 : vector<1x8x1xf32> to vector<1x8x8xf32>
    %30 = arith.subf %26, %29 : vector<1x8x8xf32>
    %31 = math.exp %30 : vector<1x8x8xf32>
    %cst_21 = arith.constant dense<0.000000e+00> : vector<1x8xf32>
    %32 = vector.multi_reduction <add>, %31, %cst_21 [2] : vector<1x8x8xf32> to vector<1x8xf32>
    %33 = vector.shape_cast %32 : vector<1x8xf32> to vector<1x8x1xf32>
    %34 = tpu.reciprocal %33 {approx = true} : vector<1x8x1xf32> -> vector<1x8x1xf32>
    %35 = vector.broadcast %34 : vector<1x8x1xf32> to vector<1x8x8xf32>
    %36 = arith.mulf %31, %35 : vector<1x8x8xf32>
    %37 = arith.truncf %36 : vector<1x8x8xf32> to vector<1x8x8xbf16>
    %cst_22 = arith.constant dense<0.000000e+00> : vector<1x8x8xf32>
    %38 = tpu.matmul %37, %25, %cst_22 {dimension_numbers = #tpu.dot_dimension_numbers<[2], [1], [1], [2], [0, 0, 0, 1, 1, 2], [0], [0]>} : vector<1x8x8xbf16>, vector<1x8x8xbf16>, vector<1x8x8xf32> -> vector<1x8x8xf32>
    %39 = vector.shape_cast %38 : vector<1x8x8xf32> to vector<8x8xf32>
    %40 = arith.truncf %39 : vector<8x8xf32> to vector<8x8xbf16>
    %41 = vector.extract_strided_slice %21 {offsets = [0, 0], sizes = [8, 32], strides = [1, 1]} : vector<32x32xbf16> to vector<8x32xbf16>
    %cst_23 = arith.constant dense<0.000000e+00> : vector<8x32xf32>
    %42 = tpu.matmul %40, %41, %cst_23 {dimension_numbers = #tpu.dot_dimension_numbers<[1], [0], [0], [1], [0, 0, 1, 1], [], []>} : vector<8x8xbf16>, vector<8x32xbf16>, vector<8x32xf32> -> vector<8x32xf32>
    %43 = arith.addf %22, %42 : vector<8x32xf32>
    %44 = vector.extract_strided_slice %18 {offsets = [0, 0, 8], sizes = [1, 8, 8], strides = [1, 1, 1]} : vector<1x8x32xbf16> to vector<1x8x8xbf16>
    %45 = vector.extract_strided_slice %19 {offsets = [0, 0, 8], sizes = [1, 8, 8], strides = [1, 1, 1]} : vector<1x8x32xbf16> to vector<1x8x8xbf16>
    %46 = vector.extract_strided_slice %20 {offsets = [0, 0, 8], sizes = [1, 8, 8], strides = [1, 1, 1]} : vector<1x8x32xbf16> to vector<1x8x8xbf16>
    %cst_24 = arith.constant dense<0.000000e+00> : vector<1x8x8xf32>
    %47 = tpu.matmul %44, %45, %cst_24 {dimension_numbers = #tpu.dot_dimension_numbers<[2], [2], [1], [1], [0, 0, 0, 1, 1, 1], [0], [0]>} : vector<1x8x8xbf16>, vector<1x8x8xbf16>, vector<1x8x8xf32> -> vector<1x8x8xf32>
    %cst_25 = arith.constant dense<0xFF800000> : vector<1x8xf32>
    %48 = vector.multi_reduction <maximumf>, %47, %cst_25 [2] : vector<1x8x8xf32> to vector<1x8xf32>
    %49 = vector.shape_cast %48 : vector<1x8xf32> to vector<1x8x1xf32>
    %50 = vector.broadcast %49 : vector<1x8x1xf32> to vector<1x8x8xf32>
    %51 = arith.subf %47, %50 : vector<1x8x8xf32>
    %52 = math.exp %51 : vector<1x8x8xf32>
    %cst_26 = arith.constant dense<0.000000e+00> : vector<1x8xf32>
    %53 = vector.multi_reduction <add>, %52, %cst_26 [2] : vector<1x8x8xf32> to vector<1x8xf32>
    %54 = vector.shape_cast %53 : vector<1x8xf32> to vector<1x8x1xf32>
    %55 = tpu.reciprocal %54 {approx = true} : vector<1x8x1xf32> -> vector<1x8x1xf32>
    %56 = vector.broadcast %55 : vector<1x8x1xf32> to vector<1x8x8xf32>
    %57 = arith.mulf %52, %56 : vector<1x8x8xf32>
    %58 = arith.truncf %57 : vector<1x8x8xf32> to vector<1x8x8xbf16>
    %cst_27 = arith.constant dense<0.000000e+00> : vector<1x8x8xf32>
    %59 = tpu.matmul %58, %46, %cst_27 {dimension_numbers = #tpu.dot_dimension_numbers<[2], [1], [1], [2], [0, 0, 0, 1, 1, 2], [0], [0]>} : vector<1x8x8xbf16>, vector<1x8x8xbf16>, vector<1x8x8xf32> -> vector<1x8x8xf32>
    %60 = vector.shape_cast %59 : vector<1x8x8xf32> to vector<8x8xf32>
    %61 = arith.truncf %60 : vector<8x8xf32> to vector<8x8xbf16>
    %62 = vector.extract_strided_slice %21 {offsets = [8, 0], sizes = [8, 32], strides = [1, 1]} : vector<32x32xbf16> to vector<8x32xbf16>
    %cst_28 = arith.constant dense<0.000000e+00> : vector<8x32xf32>
    %63 = tpu.matmul %61, %62, %cst_28 {dimension_numbers = #tpu.dot_dimension_numbers<[1], [0], [0], [1], [0, 0, 1, 1], [], []>} : vector<8x8xbf16>, vector<8x32xbf16>, vector<8x32xf32> -> vector<8x32xf32>
    %64 = arith.addf %43, %63 : vector<8x32xf32>
    %65 = vector.extract_strided_slice %18 {offsets = [0, 0, 16], sizes = [1, 8, 8], strides = [1, 1, 1]} : vector<1x8x32xbf16> to vector<1x8x8xbf16>
    %66 = vector.extract_strided_slice %19 {offsets = [0, 0, 16], sizes = [1, 8, 8], strides = [1, 1, 1]} : vector<1x8x32xbf16> to vector<1x8x8xbf16>
    %67 = vector.extract_strided_slice %20 {offsets = [0, 0, 16], sizes = [1, 8, 8], strides = [1, 1, 1]} : vector<1x8x32xbf16> to vector<1x8x8xbf16>
    %cst_29 = arith.constant dense<0.000000e+00> : vector<1x8x8xf32>
    %68 = tpu.matmul %65, %66, %cst_29 {dimension_numbers = #tpu.dot_dimension_numbers<[2], [2], [1], [1], [0, 0, 0, 1, 1, 1], [0], [0]>} : vector<1x8x8xbf16>, vector<1x8x8xbf16>, vector<1x8x8xf32> -> vector<1x8x8xf32>
    %cst_30 = arith.constant dense<0xFF800000> : vector<1x8xf32>
    %69 = vector.multi_reduction <maximumf>, %68, %cst_30 [2] : vector<1x8x8xf32> to vector<1x8xf32>
    %70 = vector.shape_cast %69 : vector<1x8xf32> to vector<1x8x1xf32>
    %71 = vector.broadcast %70 : vector<1x8x1xf32> to vector<1x8x8xf32>
    %72 = arith.subf %68, %71 : vector<1x8x8xf32>
    %73 = math.exp %72 : vector<1x8x8xf32>
    %cst_31 = arith.constant dense<0.000000e+00> : vector<1x8xf32>
    %74 = vector.multi_reduction <add>, %73, %cst_31 [2] : vector<1x8x8xf32> to vector<1x8xf32>
    %75 = vector.shape_cast %74 : vector<1x8xf32> to vector<1x8x1xf32>
    %76 = tpu.reciprocal %75 {approx = true} : vector<1x8x1xf32> -> vector<1x8x1xf32>
    %77 = vector.broadcast %76 : vector<1x8x1xf32> to vector<1x8x8xf32>
    %78 = arith.mulf %73, %77 : vector<1x8x8xf32>
    %79 = arith.truncf %78 : vector<1x8x8xf32> to vector<1x8x8xbf16>
    %cst_32 = arith.constant dense<0.000000e+00> : vector<1x8x8xf32>
    %80 = tpu.matmul %79, %67, %cst_32 {dimension_numbers = #tpu.dot_dimension_numbers<[2], [1], [1], [2], [0, 0, 0, 1, 1, 2], [0], [0]>} : vector<1x8x8xbf16>, vector<1x8x8xbf16>, vector<1x8x8xf32> -> vector<1x8x8xf32>
    %81 = vector.shape_cast %80 : vector<1x8x8xf32> to vector<8x8xf32>
    %82 = arith.truncf %81 : vector<8x8xf32> to vector<8x8xbf16>
    %83 = vector.extract_strided_slice %21 {offsets = [16, 0], sizes = [8, 32], strides = [1, 1]} : vector<32x32xbf16> to vector<8x32xbf16>
    %cst_33 = arith.constant dense<0.000000e+00> : vector<8x32xf32>
    %84 = tpu.matmul %82, %83, %cst_33 {dimension_numbers = #tpu.dot_dimension_numbers<[1], [0], [0], [1], [0, 0, 1, 1], [], []>} : vector<8x8xbf16>, vector<8x32xbf16>, vector<8x32xf32> -> vector<8x32xf32>
    %85 = arith.addf %64, %84 : vector<8x32xf32>
    %86 = vector.extract_strided_slice %18 {offsets = [0, 0, 24], sizes = [1, 8, 8], strides = [1, 1, 1]} : vector<1x8x32xbf16> to vector<1x8x8xbf16>
    %87 = vector.extract_strided_slice %19 {offsets = [0, 0, 24], sizes = [1, 8, 8], strides = [1, 1, 1]} : vector<1x8x32xbf16> to vector<1x8x8xbf16>
    %88 = vector.extract_strided_slice %20 {offsets = [0, 0, 24], sizes = [1, 8, 8], strides = [1, 1, 1]} : vector<1x8x32xbf16> to vector<1x8x8xbf16>
    %cst_34 = arith.constant dense<0.000000e+00> : vector<1x8x8xf32>
    %89 = tpu.matmul %86, %87, %cst_34 {dimension_numbers = #tpu.dot_dimension_numbers<[2], [2], [1], [1], [0, 0, 0, 1, 1, 1], [0], [0]>} : vector<1x8x8xbf16>, vector<1x8x8xbf16>, vector<1x8x8xf32> -> vector<1x8x8xf32>
    %cst_35 = arith.constant dense<0xFF800000> : vector<1x8xf32>
    %90 = vector.multi_reduction <maximumf>, %89, %cst_35 [2] : vector<1x8x8xf32> to vector<1x8xf32>
    %91 = vector.shape_cast %90 : vector<1x8xf32> to vector<1x8x1xf32>
    %92 = vector.broadcast %91 : vector<1x8x1xf32> to vector<1x8x8xf32>
    %93 = arith.subf %89, %92 : vector<1x8x8xf32>
    %94 = math.exp %93 : vector<1x8x8xf32>
    %cst_36 = arith.constant dense<0.000000e+00> : vector<1x8xf32>
    %95 = vector.multi_reduction <add>, %94, %cst_36 [2] : vector<1x8x8xf32> to vector<1x8xf32>
    %96 = vector.shape_cast %95 : vector<1x8xf32> to vector<1x8x1xf32>
    %97 = tpu.reciprocal %96 {approx = true} : vector<1x8x1xf32> -> vector<1x8x1xf32>
    %98 = vector.broadcast %97 : vector<1x8x1xf32> to vector<1x8x8xf32>
    %99 = arith.mulf %94, %98 : vector<1x8x8xf32>
    %100 = arith.truncf %99 : vector<1x8x8xf32> to vector<1x8x8xbf16>
    %cst_37 = arith.constant dense<0.000000e+00> : vector<1x8x8xf32>
    %101 = tpu.matmul %100, %88, %cst_37 {dimension_numbers = #tpu.dot_dimension_numbers<[2], [1], [1], [2], [0, 0, 0, 1, 1, 2], [0], [0]>} : vector<1x8x8xbf16>, vector<1x8x8xbf16>, vector<1x8x8xf32> -> vector<1x8x8xf32>
    %102 = vector.shape_cast %101 : vector<1x8x8xf32> to vector<8x8xf32>
    %103 = arith.truncf %102 : vector<8x8xf32> to vector<8x8xbf16>
    %104 = vector.extract_strided_slice %21 {offsets = [24, 0], sizes = [8, 32], strides = [1, 1]} : vector<32x32xbf16> to vector<8x32xbf16>
    %cst_38 = arith.constant dense<0.000000e+00> : vector<8x32xf32>
    %105 = tpu.matmul %103, %104, %cst_38 {dimension_numbers = #tpu.dot_dimension_numbers<[1], [0], [0], [1], [0, 0, 1, 1], [], []>} : vector<8x8xbf16>, vector<8x32xbf16>, vector<8x32xf32> -> vector<8x32xf32>
    %106 = arith.addf %85, %105 : vector<8x32xf32>
    %c0_39 = arith.constant 0 : index
    %c0_40 = arith.constant 0 : index
    %107 = vector.load %arg8[%c0_39, %c0_40] : memref<1x32xf32, #tpu.memory_space<vmem>>, vector<1x32xf32>
    %108 = vector.broadcast %107 : vector<1x32xf32> to vector<8x32xf32>
    %109 = arith.addf %106, %108 : vector<8x32xf32>
    %110 = vector.shape_cast %109 : vector<8x32xf32> to vector<1x8x32xf32>
    %c0_41 = arith.constant 0 : index
    %c0_42 = arith.constant 0 : index
    %c0_43 = arith.constant 0 : index
    %111 = vector.load %arg9[%c0_41, %c0_42, %c0_43] : memref<1x8x32xf32, #tpu.memory_space<vmem>>, vector<1x8x32xf32>
    tpu.vector_store %arg9[%c0_41, %c0_42, %c0_43], %110 {strides = array<i32>} : memref<1x8x32xf32, #tpu.memory_space<vmem>>, vector<1x8x32xf32>,
    return
  }
  func.func @transform_0(%arg0: i32) -> (i32, i32, i32) {
    %c0_i32 = arith.constant 0 : i32
    %c0_i32_0 = arith.constant 0 : i32
    %c0_i32_1 = arith.constant 0 : i32
    return %arg0, %c0_i32, %c0_i32_0 : i32, i32, i32
  }
  func.func @transform_1(%arg0: i32) -> (i32, i32, i32) {
    %c0_i32 = arith.constant 0 : i32
    %c0_i32_0 = arith.constant 0 : i32
    %c0_i32_1 = arith.constant 0 : i32
    return %arg0, %c0_i32, %c0_i32_0 : i32, i32, i32
  }
  func.func @transform_2(%arg0: i32) -> (i32, i32, i32) {
    %c0_i32 = arith.constant 0 : i32
    %c0_i32_0 = arith.constant 0 : i32
    %c0_i32_1 = arith.constant 0 : i32
    return %arg0, %c0_i32, %c0_i32_0 : i32, i32, i32
  }
  func.func @transform_3(%arg0: i32) -> (i32, i32) {
    %c0_i32 = arith.constant 0 : i32
    %c0_i32_0 = arith.constant 0 : i32
    %c0_i32_1 = arith.constant 0 : i32
    return %c0_i32, %c0_i32_0 : i32, i32
  }
  func.func @transform_4(%arg0: i32) -> (i32, i32) {
    %c0_i32 = arith.constant 0 : i32
    %c0_i32_0 = arith.constant 0 : i32
    %c0_i32_1 = arith.constant 0 : i32
    return %c0_i32, %c0_i32_0 : i32, i32
  }
  func.func @transform_5(%arg0: i32) -> (i32, i32) {
    %c0_i32 = arith.constant 0 : i32
    %c0_i32_0 = arith.constant 0 : i32
    %c0_i32_1 = arith.constant 0 : i32
    return %c0_i32, %c0_i32_0 : i32, i32
  }
  func.func @transform_6(%arg0: i32) -> (i32, i32) {
    %c0_i32 = arith.constant 0 : i32
    %c0_i32_0 = arith.constant 0 : i32
    %c0_i32_1 = arith.constant 0 : i32
    return %c0_i32, %c0_i32_0 : i32, i32
  }
  func.func @transform_7(%arg0: i32) -> (i32, i32) {
    %c0_i32 = arith.constant 0 : i32
    %c0_i32_0 = arith.constant 0 : i32
    %c0_i32_1 = arith.constant 0 : i32
    return %c0_i32, %c0_i32_0 : i32, i32
  }
  func.func @transform_8(%arg0: i32) -> (i32, i32, i32) {
    %c0_i32 = arith.constant 0 : i32
    %c0_i32_0 = arith.constant 0 : i32
    %c0_i32_1 = arith.constant 0 : i32
    return %arg0, %c0_i32, %c0_i32_0 : i32, i32, i32
  }
}

</mosaic_0001>

<bundles_post_ra>
// kernel: tpu_custom_call.1
= control target key start
LH: loop header
LB: loop body
LE: loop exit
PB: predicated region body
PF: predicated region fallthrough
CT: control target
= control target key end

     0   :  { %s2483_s0 = inlined_call_operand.hbm [shape: f32[2,8,32], index: 0, kind: input, shape index: {}]   ;;  %s2484_s1 = inlined_call_operand.hbm [shape: f32[2,8,32], index: 1, kind: input, shape index: {}]   ;;  %s2485_s2 = inlined_call_operand.hbm [shape: f32[2,8,32], index: 2, kind: input, shape index: {}]   ;;  %s2486_s3 = inlined_call_operand.hbm [shape: bf16[32,32], index: 3, kind: input, shape index: {}]   ;;  %s2487_s4 = inlined_call_operand.hbm [shape: bf16[32,32], index: 4, kind: input, shape index: {}]   ;;  %s2488_s5 = inlined_call_operand.vmem [shape: bf16[32,32], index: 5, kind: input, shape index: {}]   ;;  %s2489_s6 = inlined_call_operand.hbm [shape: bf16[32,32], index: 6, kind: input, shape index: {}]   ;;  %s2490_s7 = inlined_call_operand.vmem [shape: f32[1,32], index: 7, kind: input, shape index: {}]   ;;  %s2491_s8 = inlined_call_operand.hbm [shape: f32[2,8,32], index: 8, kind: output, shape index: {}]  }
   0x1   :  { %2517 = sst [smem:[#allocation25_spill]] %s2484_s1 }
   0x2   :  { %2518 = sst [smem:[#allocation26_spill]] %s2486_s3 }
   0x3   :  { %2519 = sst [smem:[#allocation27_spill]] %s2491_s8 }
   0x4   :  { %13 = vsyncpa [#allocation3], 0 }
   0x5   :  { %15 = vsyncpa [#allocation3 + $0x1], 0 }
   0x6   :  { %16 = vsyncpa [#allocation6], 0 }
   0x7   :  { %18 = vsyncpa [#allocation6 + $0x1], 0 }
   0x8   :  { %19 = vsyncpa [#allocation9], 0 }
   0x9   :  { %20 = vsyncpa [#allocation12], 0 }
   0xa   :  { %21 = vsyncpa [#allocation4], 0 }
   0xb   :  { %23 = vsyncpa [#allocation4 + $0x1], 0  ;;  %s2026_s27 = smov 0   ;;  %s2028_s28 = smov 0  }
   0xc   :  { %s2030_s29 = smov 0   ;;  %s2032_s30 = smov 0  }
   0xd LB: > { %2520 = sst [smem:[#allocation19_spill]] %s1953_s27  ;;  %s2047_s9 = sadd.s32 4294967295, %s1965_s30   ;;  %s1965_s30 = sphi %s2032_s30, %s2559_s30   ;;  %s1961_s29 = sphi %s2030_s29, %s2563_s29   ;;  %s1957_s28 = sphi %s2028_s28, %s2562_s28   ;;  %s1953_s27 = sphi %s2026_s27, %s2561_s27  }
   0xe   : > { %2521 = sst [smem:[#allocation20_spill]] %s1965_s30  ;;  %s1422_s10 = sadd.s32 4294967294, %s1965_s30  }
   0xf   : > { %p49_p0 = scmp.ne.s32.totalorder %s1957_s28, %s1953_s27  ;;  %p2492_p1 = scmp.eq.s32.totalorder %s2047_s9, 0 }
  0x10   : > { %p236_p3 = scmp.eq.s32.totalorder %s1422_s10, 1  ;;  %p1423_p5 = scmp.ge.s32.totalorder %s1965_s30, 1 }
  0x11   : > { %p2056_p4 = por %p2492_p1, %p49_p0  ;;  %p243_p7 = scmp.lt.s32.totalorder %s1965_s30, 3 }
  0x12   : > { %p2061_p6 = por %p236_p3, %p49_p0  ;;  %s1967_s14 = smov [#allocation8]  }
  0x13   : > { %s2522_s11 = scalar_select %p2056_p4, 1, 0 }
  0x14   : > { %s2523_s12 = scalar_select %p2061_p6, 1, 0 }
  0x15   : > { %p2066_p8 = pnand %p1423_p5, %p243_p7  ;;  %s255_s15 = sshll.u32 %s1967_s14, 4  ;;  %s2070_s15 = int_to_ptr.vmem [resolvable:$true] %s255_s15 }
  0x16   : > { %2524 = sst [smem:[#allocation21_spill]] %s2523_s12  ;;  %s2082_s17 = sadd.s32 1, %s1965_s30  }
  0x17   : > { %s2525_s13 = scalar_select %p2066_p8, 1, 0 }
  0x18   : > { %p1617_p9 = pneg %p2066_p8  ;;  %2527 = sst [smem:[#allocation22_spill]] %s2082_s17 }
  0x19   : > { %s36_s18 = sadd.s32 1, %s1961_s29  ;;  %s33_s19 = ssub.s32 %s1965_s30, %s2082_s17 }
  0x1a   : > { %p2077_p11 = pnand %p1617_p9, %p2492_p1  ;;  %s2528_s3 = sld [smem:[#allocation26_spill]] }
  0x1c   : > { %s2526_s16 = scalar_select %p2077_p11, 1, 0 }
  0x1d   : > { %p2095_p13 = pneg %p2077_p11 }
  0x1f   : > { %s2529_s25 = scalar_select %p2095_p13, 1, 0 }
  0x20   : > { %s1713_s22 = scalar_lea.hbm %s2528_s3, 256 }
  0x21   : > { %p1714_p12 = scmp.ne.s32.totalorder %s2528_s3, %s1713_s22  ;;  %p1720_p5 = scmp.lt.u32.totalorder %s1713_s22, %s2528_s3 }
  0x23   : > { %p1716_p0 = pnand %p2095_p13, %p1714_p12 }
  0x25   : > { %p1717_p3 = pneg %p1716_p0 }
  0x27   : > { %p1722_p7 = pnand %p1720_p5, %p1717_p3 }
  0x29   : > { %1725 = shalt.err (!%p1722_p7)
}
  0x2a   : > { %s1726_s14 = scalar_lea.vmem %s2070_s15, 256  ;;  %p1734_p2 = scmp.lt.s32.totalorder %s2070_s15, %s2070_s15 }
  0x2b   : > { %p1727_p9 = scmp.ne.s32.totalorder %s2070_s15, %s1726_s14  ;;  %p1735_p6 = scmp.lt.s32.totalorder %s1726_s14, %s1726_s14 }
  0x2d   : > { %p1729_p10 = pnand %p1727_p9, %p2095_p13  ;;  %p1736_p12 = por %p1735_p6, %p1734_p2 }
  0x2f   : > { %p1730_p1 = pneg %p1729_p10 }
  0x31   : > { %p1737_p0 = pnand %p1736_p12, %p1730_p1 }
  0x33   : > { %1740 = shalt.err (!%p1737_p0)
}
  0x34   : > { %s2495_s20 = smov 64   ;;  %s2497_s21 = smov 4  }
  0x35   : > { %1620 = dma.hbm_to_vmem [thread:$0]  (!%p2077_p11), %s2528_s3, 256, %s2070_s15, [#allocation9], %s2495_s20, %s2495_s20, %s2497_s21  }
  0x36   : > { %p34_p1 = scmp.eq.s32.totalorder %s33_s19, 0  ;;  %p43_p2 = scmp.ne.s32.totalorder %s1961_s29, %s1957_s28 }
  0x37   : > { %p44_p6 = scmp.eq.s32.totalorder %s1965_s30, 0  ;;  %p1644_p10 = scmp.lt.s32.totalorder %s1965_s30, 2 }
  0x38   : > { %s2124_s24 = scalar_select %p34_p1, %s1961_s29, %s36_s18  }
  0x39   : > { %p45_p3 = por %p44_p6, %p43_p2  ;;  %p2531_p5 = scmp.eq.s32.totalorder %s2047_s9, 1 }
  0x3a   : > { %2530 = sst [smem:[#allocation23_spill]] %s2124_s24  ;;  %s2499_s10 = sand.u32 1, %s1961_s29  }
  0x3b   : > { %p2128_p7 = por %p2531_p5, %p43_p2  ;;  %s2134_s14 = sshll.u32 %s1965_s30, 7 }
  0x3c   : > { %s2138_s17 = sshll.u32 %s2499_s10, 3  ;;  %p2140_p9 = pnand %p1644_p10, %p45_p3 }
  0x3d   : > { %s2532_s26 = scalar_select %p2128_p7, 1, 0 }
  0x3e   : > { %s2534_s15 = scalar_select %p2140_p9, 1, 0 }
  0x3f   : > { %2533 = sst [smem:[#allocation24_spill]] %s2532_s26  ;;  %s319_s18 = sand.u32 1, %s1965_s30  }
  0x40   : > { %s2535_s1 = sld [smem:[#allocation25_spill]]  ;;  %s323_s20 = scalar_lea.vmem [#allocation5], %s2138_s17 }
  0x41   : > { %s330_s21 = sshll.u32 %s323_s20, 4  ;;  %s2154_s10 = scalar_lea.sflag [#allocation6], %s319_s18  ;;  %s2152_s21 = int_to_ptr.vmem [resolvable:$true] %s330_s21 }
  0x42   : > { %p2160_p0 = pneg %p2140_p9 }
  0x44   : > { %s2536_s24 = scalar_select %p2160_p0, 1, 0 }
  0x46   : > { %s2149_s23 = scalar_lea.hbm %s2535_s1, %s2134_s14  ;;  %s1746_s30 = scalar_lea.hbm %s2535_s1, 256 }
  0x47   : > { %s1741_s3 = scalar_lea.hbm %s2149_s23, 128  ;;  %p1747_p6 = scmp.lt.u32.totalorder %s2149_s23, %s2535_s1 }
  0x48   : > { %p1742_p12 = scmp.ne.s32.totalorder %s2149_s23, %s1741_s3  ;;  %p1748_p10 = scmp.lt.u32.totalorder %s1746_s30, %s1741_s3 }
  0x49   : > { %p1750_p5 = scmp.lt.u32.totalorder %s1741_s3, %s2149_s23 }
  0x4a   : > { %p1744_p1 = pnand %p2160_p0, %p1742_p12  ;;  %p1749_p3 = por %p1748_p10, %p1747_p6 }
  0x4c   : > { %p1745_p2 = pneg %p1744_p1  ;;  %p1751_p7 = por %p1750_p5, %p1749_p3 }
  0x4e   : > { %p1752_p4 = pnand %p1751_p7, %p1745_p2 }
  0x50   : > { %1755 = shalt.err (!%p1752_p4)
}
  0x51   : > { %s1756_s18 = scalar_lea.vmem %s2152_s21, 128  ;;  %s1970_s19 = smov [#allocation5]  }
  0x52   : > { %p1757_p12 = scmp.ne.s32.totalorder %s2152_s21, %s1756_s18  ;;  %s1761_s22 = sshll.u32 %s1970_s19, 4  ;;  %s1762_s22 = int_to_ptr.vmem [resolvable:$false] %s1761_s22 }
  0x53   : > { %s1763_s12 = scalar_lea.vmem %s1762_s22, 256  ;;  %p1764_p11 = scmp.lt.s32.totalorder %s2152_s21, %s1762_s22 }
  0x54   : > { %p1759_p1 = pnand %p1757_p12, %p2160_p0  ;;  %p1765_p13 = scmp.lt.s32.totalorder %s1763_s12, %s1756_s18 }
  0x56   : > { %p1760_p8 = pneg %p1759_p1  ;;  %p1766_p6 = por %p1765_p13, %p1764_p11 }
  0x58   : > { %p1767_p10 = pnand %p1766_p6, %p1760_p8 }
  0x5a   : > { %1770 = shalt.err (!%p1767_p10)
}
  0x5b   : > { %1633 = dma.hbm_to_vmem [thread:$0]  (!%p2140_p9), %s2149_s23, 128, %s2152_s21, %s2154_s10  }
  0x5c   : > { %s1971_s3 = smov [#allocation10]   ;;  %s1972_s20 = smov [#allocation11]  }
  0x5d   : > { %s268_s30 = sshll.u32 %s1971_s3, 4  ;;  %s284_s1 = sshll.u32 %s1972_s20, 4  ;;  %s269_s30 = int_to_ptr.vmem [resolvable:$true] %s268_s30  ;;  %s285_s1 = int_to_ptr.vmem [resolvable:$true] %s284_s1 }
  0x5e   : > { %s1771_s22 = scalar_lea.hbm %s2487_s4, 256  ;;  %p2537_p8 = scmp.ne.s32.totalorder %s2529_s25, 0 }
  0x5f   : > { %p1772_p4 = scmp.ne.s32.totalorder %s2487_s4, %s1771_s22  ;;  %p1778_p7 = scmp.lt.u32.totalorder %s1771_s22, %s2487_s4 }
  0x61   : > { %p1774_p11 = pnand %p1772_p4, %p2537_p8 }
  0x63   : > { %p1775_p13 = pneg %p1774_p11 }
  0x65   : > { %p1780_p2 = pnand %p1778_p7, %p1775_p13 }
  0x67   : > { %1783 = shalt.err (!%p1780_p2)
}
  0x68   : > { %s1784_s21 = scalar_lea.vmem %s269_s30, 256  ;;  %p1792_p1 = scmp.lt.s32.totalorder %s269_s30, %s269_s30 }
  0x69   : > { %p1785_p3 = scmp.ne.s32.totalorder %s269_s30, %s1784_s21  ;;  %p1793_p6 = scmp.lt.s32.totalorder %s1784_s21, %s1784_s21 }
  0x6b   : > { %p1787_p5 = pnand %p1785_p3, %p2537_p8  ;;  %p1794_p10 = por %p1793_p6, %p1792_p1 }
  0x6d   : > { %p1788_p12 = pneg %p1787_p5 }
  0x6f   : > { %p1795_p9 = pnand %p1794_p10, %p1788_p12 }
  0x71   : > { %1798 = shalt.err (!%p1795_p9)
}
  0x72   : > { %p2538_p4 = scmp.ne.s32.totalorder %s2526_s16, 0  ;;  %s2539_s27 = smov 4  }
  0x73   : > { %s2540_s23 = smov 64   ;;  %s1799_s19 = scalar_lea.hbm %s2489_s6, 256 }
  0x74   : > { %1623 = dma.hbm_to_vmem [thread:$0]  (!%p2538_p4), %s2487_s4, 256, %s269_s30, [#allocation9], %s2540_s23, %s2540_s23, %s2539_s27  }
  0x75   : > { %p1800_p11 = scmp.ne.s32.totalorder %s2489_s6, %s1799_s19  ;;  %p1806_p7 = scmp.lt.u32.totalorder %s1799_s19, %s2489_s6 }
  0x77   : > { %p1802_p9 = pnand %p1800_p11, %p2537_p8 }
  0x79   : > { %p1803_p13 = pneg %p1802_p9 }
  0x7b   : > { %p1808_p2 = pnand %p1806_p7, %p1803_p13 }
  0x7d   : > { %1811 = shalt.err (!%p1808_p2)
}
  0x7e   : > { %s1812_s8 = scalar_lea.vmem %s285_s1, 256  ;;  %p1820_p1 = scmp.lt.s32.totalorder %s285_s1, %s285_s1 }
  0x7f   : > { %p1813_p3 = scmp.ne.s32.totalorder %s285_s1, %s1812_s8  ;;  %p1821_p6 = scmp.lt.s32.totalorder %s1812_s8, %s1812_s8 }
  0x81   : > { %p1815_p5 = pnand %p1813_p3, %p2537_p8  ;;  %p1822_p10 = por %p1821_p6, %p1820_p1 }
  0x83   : > { %p1816_p12 = pneg %p1815_p5 }
  0x85   : > { %p1823_p0 = pnand %p1822_p10, %p1816_p12 }
  0x87   : > { %1826 = shalt.err (!%p1823_p0)
}
  0x88   : > { %1626 = dma.hbm_to_vmem [thread:$0]  (!%p2538_p4), %s2489_s6, 256, %s285_s1, [#allocation12], %s2540_s23, %s2540_s23, %s2539_s27  }
  0x89   : > { %s2230_s20 = scalar_lea.hbm %s2483_s0, %s2134_s14  ;;  %s305_s16 = scalar_lea.vmem [#allocation2], %s2138_s17 }
  0x8a   : > { %s312_s19 = sshll.u32 %s305_s16, 4  ;;  %s2239_s12 = scalar_lea.hbm %s2485_s2, %s2134_s14  ;;  %s2233_s19 = int_to_ptr.vmem [resolvable:$true] %s312_s19 }
  0x8b   : > { %s2541_s21 = sand.u32 1, %s1961_s29   ;;  %s1827_s27 = scalar_lea.hbm %s2230_s20, 128 }
  0x8c   : > { %s302_s1 = scalar_lea.sflag [#allocation3], %s2541_s21  ;;  %p1828_p0 = scmp.ne.s32.totalorder %s2230_s20, %s1827_s27 }
  0x8d   : > { %p2542_p8 = scmp.ne.s32.totalorder %s2536_s24, 0  ;;  %s1832_s30 = scalar_lea.hbm %s2483_s0, 256 }
  0x8e   : > { %p1833_p9 = scmp.lt.u32.totalorder %s2230_s20, %s2483_s0  ;;  %p1834_p13 = scmp.lt.u32.totalorder %s1832_s30, %s1827_s27 }
  0x8f   : > { %p1830_p4 = pnand %p1828_p0, %p2542_p8  ;;  %p1836_p2 = scmp.lt.u32.totalorder %s1827_s27, %s2230_s20 }
  0x90   : > { %p1835_p7 = por %p1834_p13, %p1833_p9 }
  0x91   : > { %p1831_p11 = pneg %p1830_p4 }
  0x92   : > { %p1837_p3 = por %p1836_p2, %p1835_p7 }
  0x94   : > { %p1838_p5 = pnand %p1837_p3, %p1831_p11 }
  0x96   : > { %1841 = shalt.err (!%p1838_p5)
}
  0x97   : > { %s1842_s14 = scalar_lea.vmem %s2233_s19, 128  ;;  %s1973_s3 = smov [#allocation2]  }
  0x98   : > { %p1843_p12 = scmp.ne.s32.totalorder %s2233_s19, %s1842_s14  ;;  %s1847_s16 = sshll.u32 %s1973_s3, 4  ;;  %s1848_s16 = int_to_ptr.vmem [resolvable:$false] %s1847_s16 }
  0x99   : > { %s1849_s22 = scalar_lea.vmem %s1848_s16, 256  ;;  %p1850_p10 = scmp.lt.s32.totalorder %s2233_s19, %s1848_s16 }
  0x9a   : > { %p1845_p1 = pnand %p1843_p12, %p2542_p8  ;;  %p1851_p0 = scmp.lt.s32.totalorder %s1849_s22, %s1842_s14 }
  0x9c   : > { %p1846_p6 = pneg %p1845_p1  ;;  %p1852_p4 = por %p1851_p0, %p1850_p10 }
  0x9e   : > { %p1853_p9 = pnand %p1852_p4, %p1846_p6 }
  0xa0   : > { %1856 = shalt.err (!%p1853_p9)
}
  0xa1   : > { %p2543_p11 = scmp.ne.s32.totalorder %s2534_s15, 0  ;;  %s341_s18 = scalar_lea.vmem [#allocation7], %s2138_s17 }
  0xa2   : > { %s348_s21 = sshll.u32 %s341_s18, 4  ;;  %s1857_s27 = scalar_lea.hbm %s2239_s12, 128  ;;  %s349_s21 = int_to_ptr.vmem [resolvable:$true] %s348_s21 }
  0xa3   : > { %1630 = dma.hbm_to_vmem [thread:$0]  (!%p2543_p11), %s2230_s20, 128, %s2233_s19, %s302_s1  }
  0xa4   : > { %p1858_p13 = scmp.ne.s32.totalorder %s2239_s12, %s1857_s27  ;;  %s1862_s30 = scalar_lea.hbm %s2485_s2, 256 }
  0xa5   : > { %p1863_p3 = scmp.lt.u32.totalorder %s2239_s12, %s2485_s2  ;;  %p1864_p5 = scmp.lt.u32.totalorder %s1862_s30, %s1857_s27 }
  0xa6   : > { %p1860_p7 = pnand %p1858_p13, %p2542_p8  ;;  %p1866_p1 = scmp.lt.u32.totalorder %s1857_s27, %s2239_s12 }
  0xa7   : > { %p1865_p12 = por %p1864_p5, %p1863_p3 }
  0xa8   : > { %p1861_p2 = pneg %p1860_p7 }
  0xa9   : > { %p1867_p6 = por %p1866_p1, %p1865_p12 }
  0xab   : > { %p1868_p10 = pnand %p1867_p6, %p1861_p2 }
  0xad   : > { %1871 = shalt.err (!%p1868_p10)
}
  0xae   : > { %s1872_s17 = scalar_lea.vmem %s349_s21, 128  ;;  %s1974_s20 = smov [#allocation7]  }
  0xaf   : > { %p1873_p0 = scmp.ne.s32.totalorder %s349_s21, %s1872_s17  ;;  %s1877_s19 = sshll.u32 %s1974_s20, 4  ;;  %s1878_s19 = int_to_ptr.vmem [resolvable:$false] %s1877_s19 }
  0xb0   : > { %s1879_s1 = scalar_lea.vmem %s1878_s19, 256  ;;  %p1880_p13 = scmp.lt.s32.totalorder %s349_s21, %s1878_s19 }
  0xb1   : > { %p1875_p4 = pnand %p1873_p0, %p2542_p8  ;;  %p1881_p7 = scmp.lt.s32.totalorder %s1879_s1, %s1872_s17 }
  0xb3   : > { %p1876_p9 = pneg %p1875_p4  ;;  %p1882_p11 = por %p1881_p7, %p1880_p13 }
  0xb5   : > { %p1883_p3 = pnand %p1882_p11, %p1876_p9 }
  0xb7   : > { %1886 = shalt.err (!%p1883_p3)
}
  0xb8   : > { %p2544_p5 = scmp.ne.s32.totalorder %s2534_s15, 0  ;;  %p2545_p2 = scmp.ne.s32.totalorder %s2525_s13, 0 }
  0xb9   : > { %s2286_s24 = sand.u32 (!%p2545_p2), 1, %s1957_s28   ;;  %p2546_p8 = scmp.ne.s32.totalorder (!%p2545_p2), %s2522_s11, 0 }
  0xba   : > { %1636 = dma.hbm_to_vmem [thread:$0]  (!%p2544_p5), %s2239_s12, 128, %s349_s21, %s2154_s10  }
  0xbb   : > { %357 = sbr.rel (%p2545_p2) target bundleno = 2809 (0xaf9), region = 52  ;;  %s2289_s14 = sshll.u32 (!%p2545_p2), %s2286_s24, 3 }
  0xbc   : > { %s360_s3 = scalar_lea.sflag (!%p2545_p2), [#allocation3], %s2286_s24  ;;  %s363_s16 = scalar_lea.vmem (!%p2545_p2), [#allocation2], %s2289_s14 }
  0xc2   : > { %1932 = dma.done.wait (%p2546_p8), %s360_s3, 128  }
  0xc3   : > { %1934 = vsyncadd (%p2546_p8), %s360_s3, 4294967168  ;;  %s368_s13 = sand.u32 1, %s2047_s9   ;;  %s372_s15 = scalar_lea.vmem [#allocation5], %s2289_s14 }
  0xc4   : > { %s369_s10 = scalar_lea.sflag [#allocation6], %s368_s13 }
  0xc5   : > { %1936 = dma.done.wait (%p2546_p8), %s369_s10, 256  }
  0xc6   : > { %1938 = vsyncadd (%p2546_p8), %s369_s10, 4294967040  ;;  %s381_s12 = scalar_lea.vmem [#allocation7], %s2289_s14  ;;  %p2547_p11 = scmp.eq.s32.totalorder %s2047_s9, 0 }
  0xc8   : > { %1940 = dma.done.wait (%p2547_p11), [#allocation9], 512   ;;  %p2548_p12 = pmov %p2547_p11 }
  0xc9   : > { %p2549_p1 = pmov %p2547_p11 }
  0xca   : > { %1942 = vsyncadd (%p2548_p12), [#allocation9], 4294966784 }
  0xcb   : > { %1944 = dma.done.wait (%p2549_p1), [#allocation12], 256   ;;  %p2550_p6 = pmov %p2549_p1 }
  0xcc   : > { %v1975_v0 = vmov 0.0   ;;  %vm1976_vm0 = vmmov 0   ;;  %v1691_v1 = vld [vmem:[#allocation10] sm:$0xff]   ;;  %v1692_v2 = vld [vmem:[#allocation10 + $0x8] sm:$0xff]   ;;  %v1693_v3 = vld [vmem:[#allocation8] sm:$0xff]   ;;  %vm455_vm1 = vcmask 261120  }
  0xcd   : > { %1946 = vsyncadd (%p2550_p6), [#allocation12], 4294967040  ;;  %1509 = vmatprep.subr.bf16.mxu1 %v1975_v0  ;;  %1501 = vmatprep.subr.bf16.mxu0 %v1975_v0  ;;  %v499_v4 = vld [vmem:[%s372_s15] sm:$0xff]  ;;  %v437_v6 = vld [vmem:[%s363_s16] sm:$0xff]  ;;  %vm628_vm2 = vcmask 64512   ;;  %s1977_s11 = smov 120  }
  0xce   : > { %1513 = vmatprep.mubr.msk.bf16.mxu1 %vm1976_vm0, %v1975_v0  ;;  %1505 = vmatprep.mubr.msk.bf16.mxu0 %vm1976_vm0, %v1975_v0  ;;  %v1694_v5 = vld [vmem:[#allocation8 + $0x8] sm:$0xff]   ;;  %v500_v7 = vpack.c.bf16 %v499_v4, %v499_v4  ;;  %v438_v8 = vpack.c.bf16 %v437_v6, %v437_v6  ;;  %v1695_v20 = vld [vmem:[%s2488_s5] sm:$0xff]   ;;  %v1696_v21 = vld [vmem:[%s2488_s5 + $0x8] sm:$0xff]   ;;  %s1978_s23 = smov 112   ;;  %vm690_vm3 = vcmask 1043456   ;;  %s1979_s8 = smov 104  }
  0xcf   : > { %1510 = vmatpush3.bf16.msra.mxu1 %v1691_v1  ;;  %1502 = vmatpush3.bf16.msra.mxu0 %v1693_v3  ;;  %v560_v22 = vld [vmem:[%s381_s12] sm:$0xff]  ;;  %v625_v57 = vld [vmem:[#allocation11 + $0x4] sm:$0xf]  ;;  %v624_v63 = vld [vmem:[#allocation11] sm:$0xf]  ;;  %s2551_s25 = sld [smem:[#allocation24_spill]] }
  0xd0   : > { %1511 = vmatprep.subr.bf16.mxu1 %v1975_v0  ;;  %1503 = vmatprep.subr.bf16.mxu0 %v1975_v0  ;;  %v561_v23 = vpack.c.bf16 %v560_v22, %v560_v22  ;;  %v853_v58 = vsel %vm690_vm3, %v625_v57, 0  ;;  %v899_v3 = vsel %vm690_vm3, %v624_v63, 0  ;;  %v627_v63 = vld [vmem:[#allocation11 + $0xc] sm:$0xf]  ;;  %s1465_s17 = sshll.u32 %s2047_s9, 7  ;;  %s435_s20 = scalar_lea.vmem [#allocation13], %s2289_s14 }
  0xd1   : > { %s1280_s19 = sshll.u32 %s435_s20, 4  ;;  %s2552_s16 = sld [smem:[#allocation27_spill]]  ;;  %s2440_s19 = int_to_ptr.vmem [resolvable:$true] %s1280_s19 }
  0xd2   : > { %s1267_s9 = scalar_lea.sflag [#allocation4], %s2286_s24  ;;  %s1887_s14 = scalar_lea.vmem %s2440_s19, 128 }
  0xd3   : > { %1512 = vmatpush3.bf16.msra.mxu1 %v1692_v2  ;;  %1504 = vmatpush3.bf16.msra.mxu0 %v1694_v5  ;;  %p1888_p10 = scmp.ne.s32.totalorder %s2440_s19, %s1887_s14  ;;  %s1980_s10 = smov [#allocation13]  }
  0xd4   : > { %1525 = vmatprep.subr.bf16.mxu1 %v1975_v0  ;;  %1517 = vmatprep.subr.bf16.mxu0 %v1975_v0  ;;  %s1891_s15 = sshll.u32 %s1980_s10, 4  ;;  %s1892_s15 = int_to_ptr.vmem [resolvable:$false] %s1891_s15 }
  0xd5   : > { %p2553_p0 = scmp.ne.s32.totalorder %s2551_s25, 0  ;;  %s1893_s12 = scalar_lea.vmem %s1892_s15, 256 }
  0xd6   : > { %1514 = vmatmul.mubr.msk.bf16.vlgmr.msra.gmra.mrb[0].mxu1 %vm455_vm1, %v500_v7  ;;  %1506 = vmatmul.mubr.msk.bf16.vlgmr.msra.gmra.mrb[0].mxu0 %vm455_vm1, %v438_v8  ;;  %p1894_p13 = scmp.lt.s32.totalorder %s2440_s19, %s1892_s15  ;;  %p1895_p7 = scmp.lt.s32.totalorder %s1893_s12, %s1887_s14 }
  0xd7   : > { %1527 = vmatprep.mubr.msk.bf16.mxu1 %vm1976_vm0, %v1975_v0  ;;  %1521 = vmatprep.mubr.msk.bf16.mxu0 %vm1976_vm0, %v1975_v0  ;;  %s2438_s13 = scalar_lea.hbm %s2552_s16, %s1465_s17  ;;  %p1889_p4 = pnand %p1888_p10, %p2553_p0 }
  0xd8   : > { %1518 = vmatpush3.bf16.msra.mxu0 %v1695_v20  ;;  %p1896_p3 = por %p1895_p7, %p1894_p13 }
  0xd9   : > { %1519 = vmatprep.subr.bf16.mxu0 %v1975_v0  ;;  %p1890_p9 = pneg %p1889_p4 }
  0xdb   : > { %p1897_p5 = pnand %p1896_p3, %p1890_p9 }
  0xdc   : > { %1520 = vmatpush3.bf16.msra.mxu0 %v1696_v21 }
  0xdd   : > { %1531 = vmatprep.subr.bf16.mxu0 %v1975_v0 }
  0xdf   : > { %1522 = vmatmul.mubr.msk.bf16.vlgmr.msra.gmra.mrb[4].mxu0 %vm455_vm1, %v561_v23 }
  0xe0   : > { %1533 = vmatprep.mubr.msk.bf16.mxu0 %vm1976_vm0, %v1975_v0 }
 0x1a9   : > { %v554_v9 = vpop.f32.mrb[0].mxu1  ;;  %v493_v13 = vpop.f32.mrb[0].mxu0 }
 0x1aa   : > { %v2328_v10 = vpack.c.bf16 %v554_v9, %v554_v9  ;;  %v1515_v11 = vpop.f32.mrb[1].mxu1  ;;  %v2334_v16 = vpack.c.bf16 %v493_v13, %v493_v13  ;;  %v1507_v17 = vpop.f32.mrb[1].mxu0 }
 0x1ab   : > { %v557_v12 = vpop.f32.mrb[2].mxu1  ;;  %v496_v18 = vpop.f32.mrb[2].mxu0 }
 0x1ac   : > { %739 = vrot.lane.b32.xlu0 %v2328_v10, %s1977_s11  ;;  %v1516_v14 = vpop.f32.mrb[3].mxu1  ;;  %v633_v15 = vsel %vm628_vm2, %v2328_v10, 0  ;;  %v1508_v19 = vpop.f32.mrb[3].mxu0 }
 0x1ad   : > { %1526 = vmatpush3.bf16.xpose.msra.mxu1 %v633_v15 }
 0x1ae   : > { %1537 = vmatprep.subr.bf16.mxu1 %v1975_v0 }
 0x1b0   : > { %736 = vrot.lane.b32.xlu0 %v2334_v16, %s1977_s11 }
 0x1b2   : > { %v615_v40 = vpop.f32.mrb[4].mxu0 }
 0x1b3   : > { %v1523_v41 = vpop.f32.mrb[5].mxu0  ;;  %v2364_v46 = vpack.c.bf16 %v615_v40, %v615_v40 }
 0x1b4   : > { %1528 = vmatmul.mubr.msk.bf16.vlgmr.msra.gmra.mrb[4].mxu1 %vm628_vm2, %v2334_v16  ;;  %v618_v42 = vpop.f32.mrb[6].mxu0 }
 0x1b5   : > { %1539 = vmatprep.mubr.msk.bf16.mxu1 %vm1976_vm0, %v1975_v0  ;;  %v1524_v43 = vpop.f32.mrb[7].mxu0  ;;  %v692_v47 = vsel %vm690_vm3, %v2364_v46, 0 }
 0x1b6   : > { %1532 = vmatpush3.bf16.msra.mxu0 %v692_v47 }
 0x1b7   : > { %1543 = vmatprep.subr.bf16.mxu0 %v1975_v0 }
 0x21e   : > { %v740_v24 = vpop.permute.xlu0 %739 }
 0x21f   : > { %v745_v25 = vsel %vm628_vm2, %v740_v24, 0 }
 0x220   : > { %1538 = vmatpush3.bf16.xpose.msra.mxu1 %v745_v25 }
 0x221   : > { %1549 = vmatprep.subr.bf16.mxu1 %v1975_v0 }
 0x222   : > { %v737_v26 = vpop.permute.xlu0 %736 }
 0x227   : > { %1540 = vmatmul.mubr.msk.bf16.vlgmr.msra.gmra.mrb[8].mxu1 %vm628_vm2, %v737_v26 }
 0x228   : > { %1551 = vmatprep.mubr.msk.bf16.mxu1 %vm1976_vm0, %v1975_v0  ;;  %1550 = vmatpush3.bf16.msra.mxu1 %v853_v58 }
 0x229   : > { %1561 = vmatprep.subr.bf16.mxu1 %v1975_v0 }
 0x287   : > { %v669_v27 = vpop.f32.mrb[4].mxu1 }
 0x288   : > { %v1529_v28 = vpop.f32.mrb[5].mxu1  ;;  %v675_v29 = vsel %vm628_vm2, %v669_v27, -inf }
 0x289   : > { %676 = vmax.xlane.f32.xlu1 %v675_v29  ;;  %v672_v30 = vpop.f32.mrb[6].mxu1 }
 0x28a   : > { %v1530_v31 = vpop.f32.mrb[7].mxu1 }
 0x2fa   : > { %v781_v32 = vpop.f32.mrb[8].mxu1 }
 0x2fb   : > { %v1541_v33 = vpop.f32.mrb[9].mxu1  ;;  %v787_v34 = vsel %vm628_vm2, %v781_v32, -inf }
 0x2fc   : > { %788 = vmax.xlane.f32.xlu1 %v787_v34  ;;  %v784_v35 = vpop.f32.mrb[10].mxu1 }
 0x2fd   : > { %v1542_v36 = vpop.f32.mrb[11].mxu1 }
 0x316   : > { %v677_v37 = vpop.xlane.xlu1 %676 }
 0x317   : > { %v678_v38 = vsub.f32 %v669_v27, %v677_v37 }
 0x319   : > { %v679_v39 = vmul.f32 1.442695, %v678_v38 }
 0x31b   : > { %1697 = vpow2.f32 %v679_v39 }
 0x325   : > { %v1698_v44 = vpop.eup %1697 }
 0x326   : > { %v681_v45 = vsel %vm628_vm2, %v1698_v44, 0.0 }
 0x327   : > { %682 = vadd.xlane.f32.xlu0 %v681_v45 }
 0x33d   : > { %1003 = vrot.lane.b32.xlu0 %v2364_v46, %s1978_s23 }
 0x389   : > { %v789_v48 = vpop.xlane.xlu1 %788 }
 0x38a   : > { %v790_v49 = vsub.f32 %v781_v32, %v789_v48 }
 0x38c   : > { %v791_v50 = vmul.f32 1.442695, %v790_v49 }
 0x38e   : > { %1699 = vpow2.f32 %v791_v50 }
 0x398   : > { %v1700_v51 = vpop.eup %1699 }
 0x399   : > { %v793_v52 = vsel %vm628_vm2, %v1700_v51, 0.0 }
 0x39a   : > { %794 = vadd.xlane.f32.xlu1 %v793_v52 }
 0x3ab   : > { %800 = vrot.lane.b32.xlu1 %v2364_v46, %s1977_s11 }
 0x3af   : > { %943 = vrot.lane.b32.xlu1 %v2328_v10, %s1978_s23 }
 0x3b3   : > { %941 = vrot.lane.b32.xlu1 %v2334_v16, %s1978_s23 }
 0x3b4   : > { %v683_v53 = vpop.xlane.xlu0 %682 }
 0x3b5   : > { %1701 = vrcp.f32 %v683_v53 }
 0x3b8   : > { %v1004_v4 = vpop.permute.xlu0 %1003 }
 0x3b9   : > { %v1009_v9 = vsel %vm690_vm3, %v1004_v4, 0 }
 0x3bf   : > { %v1702_v54 = vpop.eup %1701 }
 0x3c0   : > { %v685_v55 = vmul.f32 %v1702_v54, %v1698_v44 }
 0x3c2   : > { %v686_v56 = vpack.c.bf16 %v685_v55, %v685_v55 }
 0x3c4   : > { %1534 = vmatmul.mubr.msk.bf16.vlgmr.msra.gmra.mrb[8].mxu0 %vm628_vm2, %v686_v56 }
 0x3c5   : > { %1545 = vmatprep.mubr.msk.bf16.mxu0 %vm1976_vm0, %v1975_v0 }
 0x427   : > { %v795_v59 = vpop.xlane.xlu1 %794 }
 0x428   : > { %1703 = vrcp.f32 %v795_v59 }
 0x42b   : > { %v801_v60 = vpop.permute.xlu1 %800 }
 0x42c   : > { %v806_v61 = vsel %vm690_vm3, %v801_v60, 0 }
 0x42d   : > { %1544 = vmatpush3.bf16.msra.mxu0 %v806_v61 }
 0x42e   : > { %1555 = vmatprep.subr.bf16.mxu0 %v1975_v0 }
 0x42f   : > { %v944_v12 = vpop.permute.xlu1 %943 }
 0x430   : > { %v949_v18 = vsel %vm628_vm2, %v944_v12, 0 }
 0x432   : > { %v1704_v62 = vpop.eup %1703 }
 0x433   : > { %v797_v1 = vmul.f32 %v1704_v62, %v1700_v51  ;;  %v942_v20 = vpop.permute.xlu1 %941 }
 0x435   : > { %v798_v2 = vpack.c.bf16 %v797_v1, %v797_v1 }
 0x437   : > { %1546 = vmatmul.mubr.msk.bf16.vlgmr.msra.gmra.mrb[12].mxu0 %vm628_vm2, %v798_v2 }
 0x438   : > { %1556 = vmatpush3.bf16.msra.mxu0 %v899_v3  ;;  %1557 = vmatprep.mubr.msk.bf16.mxu0 %vm1976_vm0, %v1975_v0 }
 0x439   : > { %1567 = vmatprep.subr.bf16.mxu0 %v1975_v0 }
 0x497   : > { %v728_v5 = vpop.f32.mrb[8].mxu0 }
 0x498   : > { %v734_v6 = vpack.c.bf16 %v728_v5, %v728_v5  ;;  %v1535_v7 = vpop.f32.mrb[9].mxu0 }
 0x499   : > { %v731_v8 = vpop.f32.mrb[10].mxu0 }
 0x49a   : > { %v1536_v11 = vpop.f32.mrb[11].mxu0  ;;  %1558 = vmatmul.mubr.msk.bf16.vlgmr.msra.gmra.mrb[16].mxu0 %vm628_vm2, %v734_v6 }
 0x49b   : > { %1568 = vmatpush3.bf16.msra.mxu0 %v1009_v9  ;;  %1569 = vmatprep.mubr.msk.bf16.mxu0 %vm1976_vm0, %v1975_v0 }
 0x49c   : > { %1579 = vmatprep.subr.bf16.mxu0 %v1975_v0 }
 0x50a   : > { %v842_v13 = vpop.f32.mrb[12].mxu0 }
 0x50b   : > { %v848_v14 = vpack.c.bf16 %v842_v13, %v842_v13  ;;  %v1547_v15 = vpop.f32.mrb[13].mxu0 }
 0x50c   : > { %v845_v17 = vpop.f32.mrb[14].mxu0 }
 0x50d   : > { %v1548_v19 = vpop.f32.mrb[15].mxu0  ;;  %1552 = vmatmul.mubr.msk.bf16.vlgmr.msra.gmra.mrb[12].mxu1 %vm628_vm2, %v848_v14 }
 0x50e   : > { %1562 = vmatpush3.bf16.xpose.msra.mxu1 %v949_v18  ;;  %1563 = vmatprep.mubr.msk.bf16.mxu1 %vm1976_vm0, %v1975_v0  ;;  %v1463_v19 = vld [vmem:[%s2490_s7] ss:$0 sm:$0xff] }
 0x50f   : > { %1573 = vmatprep.subr.bf16.mxu1 %v1975_v0 }
 0x515   : > { %1564 = vmatmul.mubr.msk.bf16.vlgmr.msra.gmra.mrb[16].mxu1 %vm628_vm2, %v942_v20 }
 0x516   : > { %1575 = vmatprep.mubr.msk.bf16.mxu1 %vm1976_vm0, %v1975_v0 }
 0x56d   : > { %v935_v21 = vpop.f32.mrb[16].mxu0 }
 0x56e   : > { %v1559_v22 = vpop.f32.mrb[17].mxu0 }
 0x56f   : > { %v938_v23 = vpop.f32.mrb[18].mxu0 }
 0x570   : > { %v1560_v24 = vpop.f32.mrb[19].mxu0 }
 0x5e0   : > { %v889_v25 = vpop.f32.mrb[12].mxu1 }
 0x5e1   : > { %v2400_v26 = vadd.f32 %v935_v21, %v889_v25  ;;  %v1553_v27 = vpop.f32.mrb[13].mxu1 }
 0x5e2   : > { %v892_v28 = vpop.f32.mrb[14].mxu1 }
 0x5e3   : > { %v1554_v29 = vpop.f32.mrb[15].mxu1 }
 0x5e8   : > { %v985_v30 = vpop.f32.mrb[16].mxu1 }
 0x5e9   : > { %v1565_v31 = vpop.f32.mrb[17].mxu1  ;;  %v991_v32 = vsel %vm628_vm2, %v985_v30, -inf }
 0x5ea   : > { %992 = vmax.xlane.f32.xlu1 %v991_v32  ;;  %v988_v33 = vpop.f32.mrb[18].mxu1 }
 0x5eb   : > { %v1566_v34 = vpop.f32.mrb[19].mxu1 }
 0x677   : > { %v993_v35 = vpop.xlane.xlu1 %992 }
 0x678   : > { %v994_v36 = vsub.f32 %v985_v30, %v993_v35 }
 0x67a   : > { %v995_v37 = vmul.f32 1.442695, %v994_v36 }
 0x67c   : > { %1705 = vpow2.f32 %v995_v37 }
 0x686   : > { %v1706_v38 = vpop.eup %1705 }
 0x687   : > { %v997_v39 = vsel %vm628_vm2, %v1706_v38, 0.0 }
 0x688   : > { %998 = vadd.xlane.f32.xlu0 %v997_v39 }
 0x69e   : > { %1101 = vrot.lane.b32.xlu0 %v2328_v10, %s1979_s8 }
 0x6a2   : > { %1099 = vrot.lane.b32.xlu0 %v2334_v16, %s1979_s8  ;;  %v626_v16 = vld [vmem:[#allocation11 + $0x8] sm:$0xf] }
 0x6a3   : > { %v1056_v47 = vsel %vm690_vm3, %v626_v16, 0 }
 0x6a4   : > { %1574 = vmatpush3.bf16.msra.mxu1 %v1056_v47 }
 0x6a5   : > { %1585 = vmatprep.subr.bf16.mxu1 %v1975_v0 }
 0x715   : > { %v999_v40 = vpop.xlane.xlu0 %998 }
 0x716   : > { %1707 = vrcp.f32 %v999_v40 }
 0x719   : > { %v1102_v43 = vpop.permute.xlu0 %1101 }
 0x71a   : > { %v1107_v45 = vsel %vm628_vm2, %v1102_v43, 0 }
 0x71d   : > { %v1100_v10 = vpop.permute.xlu0 %1099 }
 0x720   : > { %v1708_v41 = vpop.eup %1707 }
 0x721   : > { %v1001_v42 = vmul.f32 %v1708_v41, %v1706_v38 }
 0x723   : > { %v1002_v44 = vpack.c.bf16 %v1001_v42, %v1001_v42 }
 0x725   : > { %1570 = vmatmul.mubr.msk.bf16.vlgmr.msra.gmra.mrb[20].mxu0 %vm628_vm2, %v1002_v44 }
 0x726   : > { %1580 = vmatpush3.bf16.xpose.msra.mxu0 %v1107_v45  ;;  %1581 = vmatprep.mubr.msk.bf16.mxu0 %vm1976_vm0, %v1975_v0 }
 0x727   : > { %1591 = vmatprep.subr.bf16.mxu0 %v1975_v0 }
 0x72d   : > { %1582 = vmatmul.mubr.msk.bf16.vlgmr.msra.gmra.mrb[24].mxu0 %vm628_vm2, %v1100_v10 }
 0x72e   : > { %1593 = vmatprep.mubr.msk.bf16.mxu0 %vm1976_vm0, %v1975_v0 }
 0x7f8   : > { %v1045_v48 = vpop.f32.mrb[20].mxu0 }
 0x7f9   : > { %v1051_v49 = vpack.c.bf16 %v1045_v48, %v1045_v48  ;;  %v1571_v50 = vpop.f32.mrb[21].mxu0 }
 0x7fa   : > { %v1048_v51 = vpop.f32.mrb[22].mxu0 }
 0x7fb   : > { %v1572_v52 = vpop.f32.mrb[23].mxu0  ;;  %1576 = vmatmul.mubr.msk.bf16.vlgmr.msra.gmra.mrb[20].mxu1 %vm628_vm2, %v1051_v49 }
 0x7fc   : > { %1587 = vmatprep.mubr.msk.bf16.mxu1 %vm1976_vm0, %v1975_v0  ;;  %v1214_v0 = vsel %vm690_vm3, %v627_v63, 0 }
 0x7fd   : > { %1592 = vmatpush3.bf16.msra.mxu0 %v1214_v0 }
 0x800   : > { %v1143_v53 = vpop.f32.mrb[24].mxu0 }
 0x801   : > { %v1583_v54 = vpop.f32.mrb[25].mxu0  ;;  %v1149_v55 = vsel %vm628_vm2, %v1143_v53, -inf }
 0x802   : > { %1150 = vmax.xlane.f32.xlu0 %v1149_v55  ;;  %v1146_v56 = vpop.f32.mrb[26].mxu0 }
 0x803   : > { %v1584_v57 = vpop.f32.mrb[27].mxu0 }
 0x88f   : > { %v1151_v58 = vpop.xlane.xlu0 %1150 }
 0x890   : > { %v1152_v59 = vsub.f32 %v1143_v53, %v1151_v58 }
 0x892   : > { %v1153_v60 = vmul.f32 1.442695, %v1152_v59 }
 0x894   : > { %1709 = vpow2.f32 %v1153_v60 }
 0x89e   : > { %v1710_v61 = vpop.eup %1709 }
 0x89f   : > { %v1155_v62 = vsel %vm628_vm2, %v1710_v61, 0.0 }
 0x8a0   : > { %1156 = vadd.xlane.f32.xlu1 %v1155_v62 }
 0x8b1   : > { %1161 = vrot.lane.b32.xlu1 %v2364_v46, %s1979_s8 }
 0x8ce   : > { %v1092_v1 = vpop.f32.mrb[20].mxu1 }
 0x8cf   : > { %v1098_v2 = vadd.f32 %v1092_v1, %v2400_v26  ;;  %v1577_v3 = vpop.f32.mrb[21].mxu1 }
 0x8d0   : > { %v1095_v4 = vpop.f32.mrb[22].mxu1 }
 0x8d1   : > { %v1578_v5 = vpop.f32.mrb[23].mxu1 }
 0x92d   : > { %v1157_v6 = vpop.xlane.xlu1 %1156 }
 0x92e   : > { %1711 = vrcp.f32 %v1157_v6 }
 0x931   : > { %v1162_v7 = vpop.permute.xlu1 %1161 }
 0x932   : > { %v1167_v8 = vsel %vm690_vm3, %v1162_v7, 0 }
 0x933   : > { %1586 = vmatpush3.bf16.msra.mxu1 %v1167_v8 }
 0x938   : > { %v1712_v9 = vpop.eup %1711 }
 0x939   : > { %v1159_v46 = vmul.f32 %v1712_v9, %v1710_v61 }
 0x93b   : > { %v1160_v11 = vpack.c.bf16 %v1159_v46, %v1159_v46 }
 0x93d   : > { %1588 = vmatmul.mubr.msk.bf16.vlgmr.msra.gmra.mrb[24].mxu1 %vm628_vm2, %v1160_v11 }
 0xa10   : > { %v1203_v12 = vpop.f32.mrb[24].mxu1 }
 0xa11   : > { %v1209_v13 = vpack.c.bf16 %v1203_v12, %v1203_v12  ;;  %v1589_v14 = vpop.f32.mrb[25].mxu1 }
 0xa12   : > { %v1206_v15 = vpop.f32.mrb[26].mxu1 }
 0xa13   : > { %v1590_v17 = vpop.f32.mrb[27].mxu1  ;;  %1594 = vmatmul.mubr.msk.bf16.vlgmr.msra.gmra.mrb[28].mxu0 %vm628_vm2, %v1209_v13 }
 0xae6   : > { %v1250_v18 = vpop.f32.mrb[28].mxu0 }
 0xae7   : > { %v1256_v20 = vadd.f32 %v1250_v18, %v1098_v2  ;;  %v1595_v21 = vpop.f32.mrb[29].mxu0 }
 0xae8   : > { %v1253_v22 = vpop.f32.mrb[30].mxu0 }
 0xae9   : > { %v1264_v23 = vadd.f32 %v1463_v19, %v1256_v20  ;;  %v1596_v24 = vpop.f32.mrb[31].mxu0 }
 0xaeb   : > { %1265 = vst.msk [vmem:[%s435_s20] sm:$0xff] %vm455_vm1, %v1264_v23 }
 0xaec   : > { %1900 = shalt.err (!%p1897_p5)
}
 0xaed   : > { %s1901_s24 = scalar_lea.hbm %s2438_s13, 128  ;;  %s1905_s18 = scalar_lea.hbm %s2552_s16, 256 }
 0xaee   : > { %p1902_p2 = scmp.ne.s32.totalorder %s2438_s13, %s1901_s24  ;;  %p1906_p12 = scmp.lt.u32.totalorder %s2438_s13, %s2552_s16 }
 0xaef   : > { %p1907_p1 = scmp.lt.u32.totalorder %s1905_s18, %s1901_s24  ;;  %p1909_p10 = scmp.lt.u32.totalorder %s1901_s24, %s2438_s13 }
 0xaf0   : > { %p1903_p8 = pnand %p1902_p2, %p2553_p0 }
 0xaf1   : > { %p1908_p6 = por %p1907_p1, %p1906_p12 }
 0xaf2   : > { %p1904_p11 = pneg %p1903_p8 }
 0xaf3   : > { %p1910_p4 = por %p1909_p10, %p1908_p6 }
 0xaf5   : > { %p1911_p9 = pnand %p1910_p4, %p1904_p11 }
 0xaf7   : > { %1914 = shalt.err (!%p1911_p9)
}
 0xaf8   : > { %1615 = dma.vmem_to_hbm [thread:$0]  (%p2553_p0), %s2440_s19, 128, %s2438_s13, %s1267_s9  }
 0xaf9 PF: > { %s2554_s23 = sld [smem:[#allocation19_spill]]  ;;  %s2555_s8 = sld [smem:[#allocation21_spill]] }
 0xafa   : > { %s2556_s30 = sld [smem:[#allocation20_spill]] }
 0xaff   : > { %s1292_s26 = sand.u32 1, %s2554_s23   ;;  %p2557_p13 = scmp.ne.s32.totalorder %s2555_s8, 0 }
 0xb00   : > { %p2558_p7 = scmp.ge.s32.totalorder %s2556_s30, 2  ;;  %s1293_s17 = scalar_lea.sflag [#allocation4], %s1292_s26 }
 0xb02   : > { %p1638_p3 = pnand %p2558_p7, %p2557_p13 }
 0xb04   : > { %1948 = dma.done.wait (!%p1638_p3), %s1293_s17, 128  }
 0xb05   : > { %1950 = vsyncadd (!%p1638_p3), %s1293_s17, 4294967168  ;;  %s2559_s30 = sld [smem:[#allocation22_spill]]  ;;  %s2560_s20 = sld [smem:[#allocation23_spill]] }
 0xb06   : > { %s2561_s27 = smov %s1957_s28  ;;  %s2562_s28 = smov %s1961_s29 }
 0xb0b   : > { %p26_p5 = scmp.ge.s32.totalorder %s2559_s30, 4   ;;  %s2563_s29 = smov %s2560_s20 }
 0xb0d   :  { %28 = sbr.rel (!%p26_p5) target bundleno = 13 (0xd), region = 133 }
 0xb14   :  { %1298 = vsyncpa [#allocation3], 1 }
 0xb15   :  { %1300 = vsyncpa [#allocation3 + $0x1], 1 }
 0xb16   :  { %1301 = vsyncpa [#allocation6], 1 }
 0xb17   :  { %1303 = vsyncpa [#allocation6 + $0x1], 1 }
 0xb18   :  { %1304 = vsyncpa [#allocation9], 1 }
 0xb19   :  { %1305 = vsyncpa [#allocation12], 1 }
 0xb1a   :  { %1306 = vsyncpa [#allocation4], 1 }
 0xb1b   :  { %1308 = vsyncpa [#allocation4 + $0x1], 1 }

</bundles_post_ra>
